<compile_context>
chip_gen: v6e
topology: v6e:2x2x1
jax: 0.10.0
libtpu: 0.0.40
codegen_flags: <defaults>
</compile_context>

<pallas_src>
import math

import numpy as np
import jax
import jax.numpy as jnp
from jax.experimental import pallas as pl
from jax.experimental.pallas import tpu as pltpu


# ----------------------------- schedule (host-side numpy, matches torch source) ---
def cosine_beta_schedule(timesteps, s=0.008):
    # Matches the reference module exactly (np.linspace(0, steps, steps) / steps).
    steps = timesteps + 1
    x = np.linspace(0, steps, steps)
    alphas_cumprod = np.cos((x / steps + s) / (1 + s) * np.pi * 0.5) ** 2
    alphas_cumprod = alphas_cumprod / alphas_cumprod[0]
    betas = 1 - alphas_cumprod[1:] / alphas_cumprod[:-1]
    return np.clip(betas, a_min=0, a_max=0.999)


def build_schedule(timesteps):
    betas = cosine_beta_schedule(timesteps)
    alphas = 1.0 - betas
    alphas_cumprod = np.cumprod(alphas, axis=0)
    return {
        "sqrt_alphas_cumprod": jnp.asarray(np.sqrt(alphas_cumprod), dtype=jnp.float32),
        "sqrt_one_minus_alphas_cumprod": jnp.asarray(
            np.sqrt(1.0 - alphas_cumprod), dtype=jnp.float32
        ),
    }


def sinusoidal_time_embedding(t, dim):
    half = dim // 2
    freqs = jnp.exp(
        -math.log(10000.0) * jnp.arange(half, dtype=jnp.float32) / max(half, 1)
    )
    args = t.astype(jnp.float32)[:, None] * freqs[None, :]
    emb = jnp.concatenate([jnp.sin(args), jnp.cos(args)], axis=-1)
    if dim % 2:  # odd hidden: pad one zero column so shapes match downstream
        emb = jnp.pad(emb, ((0, 0), (0, 1)))
    return emb.astype(jnp.float32)


# ----------------------------- static tiling choice --------------------------------
def _round_up(x, m):
    return ((x + m - 1) // m) * m


def _choose_tiling(din, dims):
    """Static tiling shared by prepare_params and the jitted wrapper.

    Returns (n_d, td, tk, din_pad):
      n_d     -- output-feature chunks (leading 'parallel' grid axis; 2 engages both
                 v7x TensorCores, ~free on single-TC v5e/v6e at constant block bytes)
      td      -- output-feature chunk width (multiple of 128 when n_d == 2)
      tk      -- K tile along Din (== din_pad when single-shot)
      din_pad -- Din padded so that tk divides it
    """
    n_d = 2 if (dims >= 256 and dims % 256 == 0) else 1
    td = dims // n_d
    din_128 = _round_up(din, 128)
    # Single grid step over K when one (din, td) bf16 weight chunk is <= 4 MiB:
    # no accumulator scratch, no per-step overhead.
    if din_128 * td * 2 <= (4 << 20):
        return n_d, td, din_128, din_128
    # Otherwise K-tile targeting ~2 MiB weight blocks (4 MiB double-buffered),
    # comfortably inside the scoped-VMEM budget on every TPU generation.
    tk = ((2 << 20) // (td * 2)) // 128 * 128
    tk = max(512, min(tk, 4096))
    din_pad = _round_up(din, tk)
    return n_d, td, tk, din_pad


# ----------------------------- Pallas kernels --------------------------------------
def _stage1_epilogue(feat, coef_a_ref, coef_b_ref, noise_ref, w1_ref, hpart_ref):
    # q_sample: sqrt(acp)[t] * x_start + sqrt(1-acp)[t] * noise   (f32 elementwise)
    x_noisy = coef_a_ref[...] * feat + coef_b_ref[...] * noise_ref[...]
    # first denoise_fn layer, partial contribution of this D chunk (bf16 dot, f32 acc)
    hpart_ref[0] = jnp.dot(
        x_noisy.astype(jnp.bfloat16), w1_ref[...], preferred_element_type=jnp.float32
    )


def _stage1_single_kernel(
    x_ref,       # (B_PAD, DIN_PAD) bf16
    wfeat_ref,   # (DIN_PAD, TD)    bf16
    coef_a_ref,  # (B_PAD, 1)       f32
    coef_b_ref,  # (B_PAD, 1)       f32
    noise_ref,   # (B_PAD, TD)      f32
    w1_ref,      # (TD, H)          bf16
    hpart_ref,   # (1, B_PAD, H)    f32
):
    feat = jnp.dot(x_ref[...], wfeat_ref[...], preferred_element_type=jnp.float32)
    _stage1_epilogue(feat, coef_a_ref, coef_b_ref, noise_ref, w1_ref, hpart_ref)


def _stage1_ktiled_kernel(
    x_ref,       # (B_PAD, TK)   bf16   K tile of flattened image
    wfeat_ref,   # (TK, TD)      bf16   K tile of this D chunk of w_feat
    coef_a_ref,  # (B_PAD, 1)    f32
    coef_b_ref,  # (B_PAD, 1)    f32
    noise_ref,   # (B_PAD, TD)   f32
    w1_ref,      # (TD, H)       bf16
    hpart_ref,   # (1, B_PAD, H) f32
    feat_acc,    # (B_PAD, TD)   f32    VMEM accumulator
):
    k = pl.program_id(1)

    @pl.when(k == 0)
    def _():
        feat_acc[...] = jnp.zeros_like(feat_acc)

    feat_acc[...] += jnp.dot(
        x_ref[...], wfeat_ref[...], preferred_element_type=jnp.float32
    )

    @pl.when(k == pl.num_programs(1) - 1)
    def _():
        _stage1_epilogue(
            feat_acc[...], coef_a_ref, coef_b_ref, noise_ref, w1_ref, hpart_ref
        )


def _stage2_mlp_loss_kernel(
    hpart_ref,  # (N_D, B_PAD, H) f32   partial hidden activations per D chunk
    temb_ref,   # (B_PAD, H)      f32
    b1_ref,     # (1, H)          f32
    w2_ref,     # (H, D)          bf16
    b2_ref,     # (1, D)          f32
    noise_ref,  # (B_PAD, D)      f32
    loss_ref,   # (B_PAD, 1)      f32
):
    h = jnp.sum(hpart_ref[...], axis=0)                       # reduce D chunks
    h = jnp.maximum(h + temb_ref[...] + b1_ref[...], 0.0)     # bias + time cond + ReLU
    x_recon = (
        jnp.dot(h.astype(jnp.bfloat16), w2_ref[...], preferred_element_type=jnp.float32)
        + b2_ref[...]
    )
    # p_losses, loss_type='l1': per-sample mean over non-batch dims (features are 1-D)
    loss_ref[...] = jnp.mean(
        jnp.abs(noise_ref[...] - x_recon), axis=-1, keepdims=True
    )


# ----------------------------- wrapper ----------------------------------------------
@jax.jit
def gaussian_diffusion_loss(x_img, t, noise, params, schedule):
    """Forward pass of GaussianDiffusion (train=True). Returns per-sample loss (B,).

    `params` must come from prepare_params (bf16, Din pre-padded) so no weight
    cast / pad traffic happens per call.
    """
    B = x_img.shape[0]
    x_flat = x_img.reshape(B, -1)
    din = x_flat.shape[1]

    w_feat = params["w_feat"]                 # bf16, (din_pad, dims), prepared once
    w1, w2 = params["w1"], params["w2"]       # bf16, prepared once
    b1, b2 = params["b1"], params["b2"]       # f32
    din_pad_w, dims = w_feat.shape
    hidden = w1.shape[1]

    n_d, td, tk, din_pad = _choose_tiling(din, dims)
    assert din_pad == din_pad_w, "params must be prepared with prepare_params()"
    n_k = din_pad // tk

    # extract(a, t, x_shape): gather then reshape to (B, 1)
    coef_a = schedule["sqrt_alphas_cumprod"][t].reshape(B, 1)
    coef_b = schedule["sqrt_one_minus_alphas_cumprod"][t].reshape(B, 1)
    temb = sinusoidal_time_embedding(t, hidden)
    noise = noise.astype(jnp.float32)

    # ---- pad batch to a multiple of 16 (full packed bf16 vregs; rows discarded)
    b_pad = _round_up(B, 16)
    pb = b_pad - B
    if pb:
        pad_rows = lambda a: jnp.pad(a, ((0, pb), (0, 0)))
        x_flat = pad_rows(x_flat)
        coef_a = pad_rows(coef_a)
        coef_b = pad_rows(coef_b)
        noise = pad_rows(noise)
        temb = pad_rows(temb)

    # ---- pad Din to the tile multiple (zero cols are a mathematical no-op)
    if din_pad != din:
        x_flat = jnp.pad(x_flat, ((0, 0), (0, din_pad - din)))
    x_bf16 = x_flat.astype(jnp.bfloat16)

    # ---- stage 1: feat_net matmul + q_sample + first denoise layer, D-parallel
    if n_k == 1:
        grid = (n_d,)
        in_specs = [
            pl.BlockSpec((b_pad, din_pad), lambda d: (0, 0)),   # x (whole Din)
            pl.BlockSpec((din_pad, td), lambda d: (0, d)),      # w_feat D chunk
            pl.BlockSpec((b_pad, 1), lambda d: (0, 0)),         # coef_a
            pl.BlockSpec((b_pad, 1), lambda d: (0, 0)),         # coef_b
            pl.BlockSpec((b_pad, td), lambda d: (0, d)),        # noise D chunk
            pl.BlockSpec((td, hidden), lambda d: (d, 0)),       # w1 D chunk
        ]
        out_spec = pl.BlockSpec((1, b_pad, hidden), lambda d: (d, 0, 0))
        scratch = []
        kernel = _stage1_single_kernel
        semantics = ("parallel",)
    else:
        grid = (n_d, n_k)
        in_specs = [
            pl.BlockSpec((b_pad, tk), lambda d, k: (0, k)),     # x (K-tiled)
            pl.BlockSpec((tk, td), lambda d, k: (k, d)),        # w_feat (K, D tiled)
            pl.BlockSpec((b_pad, 1), lambda d, k: (0, 0)),      # coef_a
            pl.BlockSpec((b_pad, 1), lambda d, k: (0, 0)),      # coef_b
            pl.BlockSpec((b_pad, td), lambda d, k: (0, d)),     # noise D chunk
            pl.BlockSpec((td, hidden), lambda d, k: (d, 0)),    # w1 D chunk
        ]
        out_spec = pl.BlockSpec((1, b_pad, hidden), lambda d, k: (d, 0, 0))
        scratch = [pltpu.VMEM((b_pad, td), jnp.float32)]
        kernel = _stage1_ktiled_kernel
        semantics = ("parallel", "arbitrary")

    h_partial = pl.pallas_call(
        kernel,
        out_shape=jax.ShapeDtypeStruct((n_d, b_pad, hidden), jnp.float32),
        grid_spec=pltpu.PrefetchScalarGridSpec(
            num_scalar_prefetch=0,
            grid=grid,
            in_specs=in_specs,
            out_specs=out_spec,
            scratch_shapes=scratch,
        ),
        compiler_params=pltpu.CompilerParams(
            dimension_semantics=semantics,
            # Working set: <= 4 MiB double-buffered weight blocks + small resident
            # operands; 32 MiB leaves headroom on every generation (v7x: 64 MiB/core).
            vmem_limit_bytes=32 << 20,
        ),
    )(x_bf16, w_feat, coef_a, coef_b, noise, w1)

    # ---- stage 2: combine D-chunk partials, second denoise layer, per-sample L1
    loss = pl.pallas_call(
        _stage2_mlp_loss_kernel,
        out_shape=jax.ShapeDtypeStruct((b_pad, 1), jnp.float32),
        grid_spec=pltpu.PrefetchScalarGridSpec(
            num_scalar_prefetch=0,
            grid=(1,),
            in_specs=[
                pl.BlockSpec((n_d, b_pad, hidden), lambda i: (0, 0, 0)),
                pl.BlockSpec((b_pad, hidden), lambda i: (0, 0)),
                pl.BlockSpec((1, hidden), lambda i: (0, 0)),
                pl.BlockSpec((hidden, dims), lambda i: (0, 0)),
                pl.BlockSpec((1, dims), lambda i: (0, 0)),
                pl.BlockSpec((b_pad, dims), lambda i: (0, 0)),
            ],
            out_specs=pl.BlockSpec((b_pad, 1), lambda i: (0, 0)),
        ),
        compiler_params=pltpu.CompilerParams(
            dimension_semantics=("arbitrary",),
            vmem_limit_bytes=32 << 20,
        ),
    )(h_partial, temb, b1, w2, b2, noise)

    return loss[:B, 0]


# ----------------------------- parameters -------------------------------------------
def init_params(key, din, dims, hidden):
    """f32 master weights for the feat_net stand-in and the denoise_fn MLP."""
    k1, k2, k3 = jax.random.split(key, 3)
    return {
        "w_feat": jax.random.normal(k1, (din, dims), jnp.float32) / np.sqrt(din),
        "w1": jax.random.normal(k2, (dims, hidden), jnp.float32) / np.sqrt(dims),
        "b1": jnp.zeros((1, hidden), jnp.float32),
        "w2": jax.random.normal(k3, (hidden, dims), jnp.float32) / np.sqrt(hidden),
        "b2": jnp.zeros((1, dims), jnp.float32),
    }


def prepare_params(params):
    """One-time conversion of the f32 master weights into the kernel's streaming
    layout: Din zero-padded to the tile multiple, matmul weights in bf16.
    Done once, outside the per-call jit, so no per-step cast/pad HBM traffic."""
    din, dims = params["w_feat"].shape
    _, _, _, din_pad = _choose_tiling(din, dims)
    w_feat = params["w_feat"]
    if din_pad != din:
        w_feat = jnp.pad(w_feat, ((0, din_pad - din), (0, 0)))
    return {
        "w_feat": w_feat.astype(jnp.bfloat16),
        "w1": params["w1"].astype(jnp.bfloat16),
        "b1": params["b1"].astype(jnp.float32),
        "w2": params["w2"].astype(jnp.bfloat16),
        "b2": params["b2"].astype(jnp.float32),
    }


# ----------------------------- demo --------------------------------------------------
if __name__ == "__main__":
    TIMESTEPS = 1000
    DIMS = 512      # feat_net output / diffusion feature dim
    HIDDEN = 256    # denoise_fn hidden width

    schedule = build_schedule(TIMESTEPS)
    base_key = jax.random.PRNGKey(0)

    def run_case(case_id, c, h, w, batch):
        kx, kt, kn, kp = jax.random.split(jax.random.fold_in(base_key, case_id), 4)
        x = jax.random.normal(kx, (batch, c, h, w), jnp.float32)
        # compute_loss: t ~ randint(0, num_timesteps, (b,))
        t = jax.random.randint(kt, (batch,), 0, TIMESTEPS, dtype=jnp.int32)
        # p_losses: noise ~ randn_like(feat_net(x)) -> feature-space noise (B, DIMS)
        noise = jax.random.normal(kn, (batch, DIMS), jnp.float32)
        params = prepare_params(init_params(kp, c * h * w, DIMS, HIDDEN))
        loss = gaussian_diffusion_loss(x, t, noise, params, schedule)
        loss = jax.block_until_ready(loss)
        assert loss.shape == (batch,) and loss.dtype == jnp.float32
        assert bool(jnp.all(jnp.isfinite(loss)))
        return loss

    # Small image: single-shot stage-1 path (no K tiling, no accumulator scratch).
    run_case(0, 3, 32, 32, 2)
    # Larger image: exercises the K-tiled stage-1 path (n_k > 1).
    run_case(1, 3, 64, 64, 2)

    print("KERNEL_OK")
</pallas_src>

<mosaic_0001>
module attributes {stable_mosaic.version = 11 : i64} {
  func.func @_stage1_single_kernel(%arg0: i32, %arg1: memref<16x3072xbf16, #tpu.memory_space<vmem>>, %arg2: memref<3072x256xbf16, #tpu.memory_space<vmem>>, %arg3: memref<16x1xf32, #tpu.memory_space<vmem>>, %arg4: memref<16x1xf32, #tpu.memory_space<vmem>>, %arg5: memref<16x256xf32, #tpu.memory_space<vmem>>, %arg6: memref<256x256xbf16, #tpu.memory_space<vmem>>, %arg7: memref<1x16x256xf32, #tpu.memory_space<vmem>>) attributes {dimension_semantics = [#tpu.dimension_semantics<parallel>], iteration_bounds = array<i64: 2>, scalar_prefetch = 0 : i64, scratch_operands = 0 : i64, tpu.core_type = #tpu.core_type<tc>, window_params = [{pipeline_mode = #tpu.pipeline_mode<synchronous>, transform_indices = @transform_0, window_bounds = array<i64: 16, 3072>}, {transform_indices = @transform_1, window_bounds = array<i64: 3072, 256>}, {pipeline_mode = #tpu.pipeline_mode<synchronous>, transform_indices = @transform_2, window_bounds = array<i64: 16, 1>}, {pipeline_mode = #tpu.pipeline_mode<synchronous>, transform_indices = @transform_3, window_bounds = array<i64: 16, 1>}, {transform_indices = @transform_4, window_bounds = array<i64: 16, 256>}, {transform_indices = @transform_5, window_bounds = array<i64: 256, 256>}, {transform_indices = @transform_6, window_bounds = array<i64: 1, 16, 256>}]} {
    %c0 = arith.constant 0 : index
    %c0_0 = arith.constant 0 : index
    %0 = vector.load %arg1[%c0, %c0_0] : memref<16x3072xbf16, #tpu.memory_space<vmem>>, vector<16x3072xbf16>
    %c0_1 = arith.constant 0 : index
    %c0_2 = arith.constant 0 : index
    %1 = vector.load %arg2[%c0_1, %c0_2] : memref<3072x256xbf16, #tpu.memory_space<vmem>>, vector<3072x256xbf16>
    %cst = arith.constant dense<0.000000e+00> : vector<16x256xf32>
    %2 = tpu.matmul %0, %1, %cst {dimension_numbers = #tpu.dot_dimension_numbers<[1], [0], [0], [1], [0, 0, 1, 1], [], []>} : vector<16x3072xbf16>, vector<3072x256xbf16>, vector<16x256xf32> -> vector<16x256xf32>
    %c0_3 = arith.constant 0 : index
    %c0_4 = arith.constant 0 : index
    %3 = vector.load %arg3[%c0_3, %c0_4] : memref<16x1xf32, #tpu.memory_space<vmem>>, vector<16x1xf32>
    %4 = vector.broadcast %3 : vector<16x1xf32> to vector<16x256xf32>
    %5 = arith.mulf %4, %2 : vector<16x256xf32>
    %c0_5 = arith.constant 0 : index
    %c0_6 = arith.constant 0 : index
    %6 = vector.load %arg4[%c0_5, %c0_6] : memref<16x1xf32, #tpu.memory_space<vmem>>, vector<16x1xf32>
    %c0_7 = arith.constant 0 : index
    %c0_8 = arith.constant 0 : index
    %7 = vector.load %arg5[%c0_7, %c0_8] : memref<16x256xf32, #tpu.memory_space<vmem>>, vector<16x256xf32>
    %8 = vector.broadcast %6 : vector<16x1xf32> to vector<16x256xf32>
    %9 = arith.mulf %8, %7 : vector<16x256xf32>
    %10 = arith.addf %5, %9 : vector<16x256xf32>
    %11 = arith.truncf %10 : vector<16x256xf32> to vector<16x256xbf16>
    %c0_9 = arith.constant 0 : index
    %c0_10 = arith.constant 0 : index
    %12 = vector.load %arg6[%c0_9, %c0_10] : memref<256x256xbf16, #tpu.memory_space<vmem>>, vector<256x256xbf16>
    %cst_11 = arith.constant dense<0.000000e+00> : vector<16x256xf32>
    %13 = tpu.matmul %11, %12, %cst_11 {dimension_numbers = #tpu.dot_dimension_numbers<[1], [0], [0], [1], [0, 0, 1, 1], [], []>} : vector<16x256xbf16>, vector<256x256xbf16>, vector<16x256xf32> -> vector<16x256xf32>
    %c0_12 = arith.constant 0 : index
    %c0_13 = arith.constant 0 : index
    %c0_14 = arith.constant 0 : index
    %14 = vector.load %arg7[%c0_12, %c0_13, %c0_14] : memref<1x16x256xf32, #tpu.memory_space<vmem>>, vector<1x16x256xf32>
    %15 = vector.shape_cast %14 : vector<1x16x256xf32> to vector<16x256xf32>
    %16 = vector.shape_cast %13 : vector<16x256xf32> to vector<1x16x256xf32>
    tpu.vector_store %arg7[%c0_12, %c0_13, %c0_14], %16 {strides = array<i32>} : memref<1x16x256xf32, #tpu.memory_space<vmem>>, vector<1x16x256xf32>,
    return
  }
  func.func @transform_0(%arg0: i32) -> (i32, i32) {
    %c0_i32 = arith.constant 0 : i32
    %c0_i32_0 = arith.constant 0 : i32
    %c0_i32_1 = arith.constant 0 : i32
    return %c0_i32, %c0_i32_0 : i32, i32
  }
  func.func @transform_1(%arg0: i32) -> (i32, i32) {
    %c0_i32 = arith.constant 0 : i32
    %c0_i32_0 = arith.constant 0 : i32
    return %c0_i32, %arg0 : i32, i32
  }
  func.func @transform_2(%arg0: i32) -> (i32, i32) {
    %c0_i32 = arith.constant 0 : i32
    %c0_i32_0 = arith.constant 0 : i32
    %c0_i32_1 = arith.constant 0 : i32
    return %c0_i32, %c0_i32_0 : i32, i32
  }
  func.func @transform_3(%arg0: i32) -> (i32, i32) {
    %c0_i32 = arith.constant 0 : i32
    %c0_i32_0 = arith.constant 0 : i32
    %c0_i32_1 = arith.constant 0 : i32
    return %c0_i32, %c0_i32_0 : i32, i32
  }
  func.func @transform_4(%arg0: i32) -> (i32, i32) {
    %c0_i32 = arith.constant 0 : i32
    %c0_i32_0 = arith.constant 0 : i32
    return %c0_i32, %arg0 : i32, i32
  }
  func.func @transform_5(%arg0: i32) -> (i32, i32) {
    %c0_i32 = arith.constant 0 : i32
    %c0_i32_0 = arith.constant 0 : i32
    return %arg0, %c0_i32 : i32, i32
  }
  func.func @transform_6(%arg0: i32) -> (i32, i32, i32) {
    %c0_i32 = arith.constant 0 : i32
    %c0_i32_0 = arith.constant 0 : i32
    %c0_i32_1 = arith.constant 0 : i32
    return %arg0, %c0_i32, %c0_i32_0 : i32, i32, i32
  }
}

module attributes {stable_mosaic.version = 11 : i64} {
  func.func @_stage2_mlp_loss_kernel(%arg0: i32, %arg1: memref<2x16x256xf32, #tpu.memory_space<vmem>>, %arg2: memref<16x256xf32, #tpu.memory_space<vmem>>, %arg3: memref<1x256xf32, #tpu.memory_space<vmem>>, %arg4: memref<256x512xbf16, #tpu.memory_space<vmem>>, %arg5: memref<1x512xf32, #tpu.memory_space<vmem>>, %arg6: memref<16x512xf32, #tpu.memory_space<vmem>>, %arg7: memref<16x1xf32, #tpu.memory_space<vmem>>) attributes {dimension_semantics = [#tpu.dimension_semantics<arbitrary>], iteration_bounds = array<i64: 1>, scalar_prefetch = 0 : i64, scratch_operands = 0 : i64, tpu.core_type = #tpu.core_type<tc>, window_params = [{pipeline_mode = #tpu.pipeline_mode<synchronous>, transform_indices = @transform_0, window_bounds = array<i64: 2, 16, 256>}, {pipeline_mode = #tpu.pipeline_mode<synchronous>, transform_indices = @transform_1, window_bounds = array<i64: 16, 256>}, {pipeline_mode = #tpu.pipeline_mode<synchronous>, transform_indices = @transform_2, window_bounds = array<i64: 1, 256>}, {pipeline_mode = #tpu.pipeline_mode<synchronous>, transform_indices = @transform_3, window_bounds = array<i64: 256, 512>}, {pipeline_mode = #tpu.pipeline_mode<synchronous>, transform_indices = @transform_4, window_bounds = array<i64: 1, 512>}, {pipeline_mode = #tpu.pipeline_mode<synchronous>, transform_indices = @transform_5, window_bounds = array<i64: 16, 512>}, {pipeline_mode = #tpu.pipeline_mode<synchronous>, transform_indices = @transform_6, window_bounds = array<i64: 16, 1>}]} {
    %c0 = arith.constant 0 : index
    %c0_0 = arith.constant 0 : index
    %c0_1 = arith.constant 0 : index
    %0 = vector.load %arg1[%c0, %c0_0, %c0_1] : memref<2x16x256xf32, #tpu.memory_space<vmem>>, vector<2x16x256xf32>
    %cst = arith.constant dense<0.000000e+00> : vector<16x256xf32>
    %1 = vector.multi_reduction <add>, %0, %cst [0] : vector<2x16x256xf32> to vector<16x256xf32>
    %c0_2 = arith.constant 0 : index
    %c0_3 = arith.constant 0 : index
    %2 = vector.load %arg2[%c0_2, %c0_3] : memref<16x256xf32, #tpu.memory_space<vmem>>, vector<16x256xf32>
    %3 = arith.addf %1, %2 : vector<16x256xf32>
    %c0_4 = arith.constant 0 : index
    %c0_5 = arith.constant 0 : index
    %4 = vector.load %arg3[%c0_4, %c0_5] : memref<1x256xf32, #tpu.memory_space<vmem>>, vector<1x256xf32>
    %5 = vector.broadcast %4 : vector<1x256xf32> to vector<16x256xf32>
    %6 = arith.addf %3, %5 : vector<16x256xf32>
    %cst_6 = arith.constant 0.000000e+00 : f32
    %7 = vector.broadcast %cst_6 : f32 to vector<16x256xf32>
    %8 = arith.maximumf %6, %7 : vector<16x256xf32>
    %9 = arith.truncf %8 : vector<16x256xf32> to vector<16x256xbf16>
    %c0_7 = arith.constant 0 : index
    %c0_8 = arith.constant 0 : index
    %10 = vector.load %arg4[%c0_7, %c0_8] : memref<256x512xbf16, #tpu.memory_space<vmem>>, vector<256x512xbf16>
    %cst_9 = arith.constant dense<0.000000e+00> : vector<16x512xf32>
    %11 = tpu.matmul %9, %10, %cst_9 {dimension_numbers = #tpu.dot_dimension_numbers<[1], [0], [0], [1], [0, 0, 1, 1], [], []>} : vector<16x256xbf16>, vector<256x512xbf16>, vector<16x512xf32> -> vector<16x512xf32>
    %c0_10 = arith.constant 0 : index
    %c0_11 = arith.constant 0 : index
    %12 = vector.load %arg5[%c0_10, %c0_11] : memref<1x512xf32, #tpu.memory_space<vmem>>, vector<1x512xf32>
    %13 = vector.broadcast %12 : vector<1x512xf32> to vector<16x512xf32>
    %14 = arith.addf %11, %13 : vector<16x512xf32>
    %c0_12 = arith.constant 0 : index
    %c0_13 = arith.constant 0 : index
    %15 = vector.load %arg6[%c0_12, %c0_13] : memref<16x512xf32, #tpu.memory_space<vmem>>, vector<16x512xf32>
    %16 = arith.subf %15, %14 : vector<16x512xf32>
    %17 = math.absf %16 : vector<16x512xf32>
    %cst_14 = arith.constant dense<0.000000e+00> : vector<16xf32>
    %18 = vector.multi_reduction <add>, %17, %cst_14 [1] : vector<16x512xf32> to vector<16xf32>
    %19 = vector.shape_cast %18 : vector<16xf32> to vector<16x1xf32>
    %cst_15 = arith.constant 5.120000e+02 : f32
    %20 = vector.broadcast %cst_15 : f32 to vector<16x1xf32>
    %21 = arith.divf %19, %20 : vector<16x1xf32>
    %c0_16 = arith.constant 0 : index
    %c0_17 = arith.constant 0 : index
    %22 = vector.load %arg7[%c0_16, %c0_17] : memref<16x1xf32, #tpu.memory_space<vmem>>, vector<16x1xf32>
    tpu.vector_store %arg7[%c0_16, %c0_17], %21 {strides = array<i32>} : memref<16x1xf32, #tpu.memory_space<vmem>>, vector<16x1xf32>,
    return
  }
  func.func @transform_0(%arg0: i32) -> (i32, i32, i32) {
    %c0_i32 = arith.constant 0 : i32
    %c0_i32_0 = arith.constant 0 : i32
    %c0_i32_1 = arith.constant 0 : i32
    %c0_i32_2 = arith.constant 0 : i32
    return %c0_i32, %c0_i32_0, %c0_i32_1 : i32, i32, i32
  }
  func.func @transform_1(%arg0: i32) -> (i32, i32) {
    %c0_i32 = arith.constant 0 : i32
    %c0_i32_0 = arith.constant 0 : i32
    %c0_i32_1 = arith.constant 0 : i32
    return %c0_i32, %c0_i32_0 : i32, i32
  }
  func.func @transform_2(%arg0: i32) -> (i32, i32) {
    %c0_i32 = arith.constant 0 : i32
    %c0_i32_0 = arith.constant 0 : i32
    %c0_i32_1 = arith.constant 0 : i32
    return %c0_i32, %c0_i32_0 : i32, i32
  }
  func.func @transform_3(%arg0: i32) -> (i32, i32) {
    %c0_i32 = arith.constant 0 : i32
    %c0_i32_0 = arith.constant 0 : i32
    %c0_i32_1 = arith.constant 0 : i32
    return %c0_i32, %c0_i32_0 : i32, i32
  }
  func.func @transform_4(%arg0: i32) -> (i32, i32) {
    %c0_i32 = arith.constant 0 : i32
    %c0_i32_0 = arith.constant 0 : i32
    %c0_i32_1 = arith.constant 0 : i32
    return %c0_i32, %c0_i32_0 : i32, i32
  }
  func.func @transform_5(%arg0: i32) -> (i32, i32) {
    %c0_i32 = arith.constant 0 : i32
    %c0_i32_0 = arith.constant 0 : i32
    %c0_i32_1 = arith.constant 0 : i32
    return %c0_i32, %c0_i32_0 : i32, i32
  }
  func.func @transform_6(%arg0: i32) -> (i32, i32) {
    %c0_i32 = arith.constant 0 : i32
    %c0_i32_0 = arith.constant 0 : i32
    %c0_i32_1 = arith.constant 0 : i32
    return %c0_i32, %c0_i32_0 : i32, i32
  }
}

</mosaic_0001>

<bundles_post_ra>
// kernel: gaussian_diffusion_loss.3
= control target key start
LH: loop header
LB: loop body
LE: loop exit
PB: predicated region body
PF: predicated region fallthrough
CT: control target
= control target key end

     0   :  { %v45_v38 = vlaneseq  ;;  %vm594_vm0 = vcmask 7168   ;;  %s1070_s3 = inlined_call_operand.vmem [shape: bf16[256,512], index: 3, kind: input, shape index: {}]   ;;  %s1071_s0 = inlined_call_operand.vmem [shape: f32[2,16,256], index: 0, kind: input, shape index: {}]   ;;  %s1072_s1 = inlined_call_operand.vmem [shape: f32[16,256], index: 1, kind: input, shape index: {}]   ;;  %s1073_s2 = inlined_call_operand.vmem [shape: f32[1,256], index: 2, kind: input, shape index: {}]   ;;  %s1074_s4 = inlined_call_operand.vmem [shape: f32[1,512], index: 4, kind: input, shape index: {}]   ;;  %s1075_s5 = inlined_call_operand.vmem [shape: f32[16,512], index: 5, kind: input, shape index: {}]   ;;  %s1076_s6 = inlined_call_operand.vmem [shape: f32[16,1], index: 6, kind: output, shape index: {}]  }
   0x1   :  { %v665_v0 = vld [vmem:[%s1070_s3 + $0xe4] ss:$16 sps:$4 sm:$0xff]   ;;  %v667_v1 = vld [vmem:[%s1070_s3 + $0xec] ss:$16 sps:$4 sm:$0xff]   ;;  %v669_v2 = vld [vmem:[%s1070_s3 + $0xe0] ss:$16 sps:$4 sm:$0xff]  }
   0x2   :  { %471 = vmatprep.subr.bf16.mxu0 %v665_v0  ;;  %v670_v3 = vld [vmem:[%s1070_s3 + $0xe8] ss:$16 sps:$4 sm:$0xff]   ;;  %514 = vmatprep.subr.bf16.mxu1 %v667_v1  ;;  %v671_v4 = vld [vmem:[%s1070_s3 + $0xc4] ss:$16 sps:$4 sm:$0xff]   ;;  %v673_v5 = vld [vmem:[%s1070_s3 + $0xcc] ss:$16 sps:$4 sm:$0xff]  }
   0x3   :  { %472 = vmatpush1.bf16.msra.mxu0 %v669_v2  ;;  %515 = vmatpush1.bf16.msra.mxu1 %v670_v3  ;;  %v675_v6 = vld [vmem:[%s1070_s3 + $0xc0] ss:$16 sps:$4 sm:$0xff]   ;;  %v676_v7 = vld [vmem:[%s1070_s3 + $0xc8] ss:$16 sps:$4 sm:$0xff]   ;;  %v677_v8 = vld [vmem:[%s1070_s3 + $0xa4] ss:$16 sps:$4 sm:$0xff]  }
   0x4   :  { %473 = vmatprep.subr.bf16.mxu0 %v671_v4  ;;  %516 = vmatprep.subr.bf16.mxu1 %v673_v5  ;;  %v679_v9 = vld [vmem:[%s1070_s3 + $0xac] ss:$16 sps:$4 sm:$0xff]   ;;  %v681_v10 = vld [vmem:[%s1070_s3 + $0xa0] ss:$16 sps:$4 sm:$0xff]   ;;  %v682_v11 = vld [vmem:[%s1070_s3 + $0xa8] ss:$16 sps:$4 sm:$0xff]  }
   0x5   :  { %v683_v12 = vld [vmem:[%s1070_s3 + $0x84] ss:$16 sps:$4 sm:$0xff]   ;;  %v685_v13 = vld [vmem:[%s1070_s3 + $0x8c] ss:$16 sps:$4 sm:$0xff]   ;;  %v687_v14 = vld [vmem:[%s1070_s3 + $0x80] ss:$16 sps:$4 sm:$0xff]  }
   0x6   :  { %v688_v15 = vld [vmem:[%s1070_s3 + $0x88] ss:$16 sps:$4 sm:$0xff]   ;;  %v689_v16 = vld [vmem:[%s1070_s3 + $0x64] ss:$16 sps:$4 sm:$0xff]   ;;  %v691_v17 = vld [vmem:[%s1070_s3 + $0x6c] ss:$16 sps:$4 sm:$0xff]  }
   0x7   :  { %474 = vmatpush1.bf16.msra.mxu0 %v675_v6  ;;  %517 = vmatpush1.bf16.msra.mxu1 %v676_v7  ;;  %v693_v18 = vld [vmem:[%s1070_s3 + $0x60] ss:$16 sps:$4 sm:$0xff]   ;;  %v694_v19 = vld [vmem:[%s1070_s3 + $0x68] ss:$16 sps:$4 sm:$0xff]   ;;  %v695_v20 = vld [vmem:[%s1070_s3 + $0x44] ss:$16 sps:$4 sm:$0xff]  }
   0x8   :  { %475 = vmatprep.subr.bf16.mxu0 %v677_v8  ;;  %518 = vmatprep.subr.bf16.mxu1 %v679_v9  ;;  %v697_v21 = vld [vmem:[%s1070_s3 + $0x4c] ss:$16 sps:$4 sm:$0xff]   ;;  %v699_v22 = vld [vmem:[%s1070_s3 + $0x40] ss:$16 sps:$4 sm:$0xff]   ;;  %v700_v23 = vld [vmem:[%s1070_s3 + $0x48] ss:$16 sps:$4 sm:$0xff]  }
   0x9   :  { %v701_v24 = vld [vmem:[%s1070_s3 + $0x24] ss:$16 sps:$4 sm:$0xff]   ;;  %v703_v25 = vld [vmem:[%s1070_s3 + $0x2c] ss:$16 sps:$4 sm:$0xff]   ;;  %v705_v26 = vld [vmem:[%s1070_s3 + $0x20] ss:$16 sps:$4 sm:$0xff]  }
   0xa   :  { %v706_v27 = vld [vmem:[%s1070_s3 + $0x28] ss:$16 sps:$4 sm:$0xff]   ;;  %v707_v28 = vld [vmem:[%s1070_s3 + $0x4] ss:$16 sps:$4 sm:$0xff]   ;;  %v709_v29 = vld [vmem:[%s1070_s3 + $0xc] ss:$16 sps:$4 sm:$0xff]  }
   0xb   :  { %476 = vmatpush1.bf16.msra.mxu0 %v681_v10  ;;  %519 = vmatpush1.bf16.msra.mxu1 %v682_v11  ;;  %v711_v30 = vld [vmem:[%s1070_s3] ss:$16 sps:$4 sm:$0xff]   ;;  %v712_v31 = vld [vmem:[%s1070_s3 + $0x8] ss:$16 sps:$4 sm:$0xff]   ;;  %v713_v32 = vld [vmem:[%s1070_s3 + $0x1e4] ss:$16 sps:$4 sm:$0xff]  }
   0xc   :  { %477 = vmatprep.subr.bf16.mxu0 %v683_v12  ;;  %520 = vmatprep.subr.bf16.mxu1 %v685_v13  ;;  %v715_v33 = vld [vmem:[%s1070_s3 + $0x1ec] ss:$16 sps:$4 sm:$0xff]   ;;  %v717_v34 = vld [vmem:[%s1070_s3 + $0x1e0] ss:$16 sps:$4 sm:$0xff]   ;;  %v718_v35 = vld [vmem:[%s1070_s3 + $0x1e8] ss:$16 sps:$4 sm:$0xff]  }
   0xd   :  { %v719_v36 = vld [vmem:[%s1070_s3 + $0x1c4] ss:$16 sps:$4 sm:$0xff]   ;;  %v721_v37 = vld [vmem:[%s1070_s3 + $0x1cc] ss:$16 sps:$4 sm:$0xff]   ;;  %v723_v39 = vld [vmem:[%s1070_s3 + $0x1c0] ss:$16 sps:$4 sm:$0xff]  }
   0xe   :  { %v724_v40 = vld [vmem:[%s1070_s3 + $0x1c8] ss:$16 sps:$4 sm:$0xff]   ;;  %v725_v41 = vld [vmem:[%s1070_s3 + $0x1a4] ss:$16 sps:$4 sm:$0xff]   ;;  %v727_v42 = vld [vmem:[%s1070_s3 + $0x1ac] ss:$16 sps:$4 sm:$0xff]  }
   0xf   :  { %478 = vmatpush1.bf16.msra.mxu0 %v687_v14  ;;  %521 = vmatpush1.bf16.msra.mxu1 %v688_v15  ;;  %v922_v43 = vshrl.u32 %v45_v38, 7  ;;  %v729_v44 = vld [vmem:[%s1070_s3 + $0x1a0] ss:$16 sps:$4 sm:$0xff]   ;;  %v730_v45 = vld [vmem:[%s1070_s3 + $0x1a8] ss:$16 sps:$4 sm:$0xff]  }
  0x10   :  { %479 = vmatprep.subr.bf16.mxu0 %v689_v16  ;;  %522 = vmatprep.subr.bf16.mxu1 %v691_v17  ;;  %v731_v46 = vld [vmem:[%s1070_s3 + $0x184] ss:$16 sps:$4 sm:$0xff]   ;;  %v733_v47 = vld [vmem:[%s1070_s3 + $0x18c] ss:$16 sps:$4 sm:$0xff]   ;;  %v735_v49 = vld [vmem:[%s1070_s3 + $0x180] ss:$16 sps:$4 sm:$0xff]  }
  0x11   :  { %v51_v48 = vsub.s32 1, %v922_v43  ;;  %v736_v50 = vld [vmem:[%s1070_s3 + $0x188] ss:$16 sps:$4 sm:$0xff]   ;;  %v737_v52 = vld [vmem:[%s1070_s3 + $0x164] ss:$16 sps:$4 sm:$0xff]   ;;  %v47_v6 = vsub.s32 0, %v922_v43 }
  0x12   :  { %v24_v51 = vld [vmem:[%s1071_s0 + $0x8] sm:$0xff]  ;;  %v26_v54 = vld [vmem:[%s1071_s0 + $0x18] sm:$0xff]  ;;  %v43_v61 = vld [vmem:[%s1073_s2] sm:$0x3] }
  0x13   :  { %480 = vmatpush1.bf16.msra.mxu0 %v693_v18  ;;  %523 = vmatpush1.bf16.msra.mxu1 %v694_v19  ;;  %v739_v53 = vld [vmem:[%s1070_s3 + $0x16c] ss:$16 sps:$4 sm:$0xff]   ;;  %v52_v62 = vrot.slane %v43_v61, %v51_v48  ;;  %v23_v63 = vld [vmem:[%s1071_s0] sm:$0xff]  ;;  %v25_v0 = vld [vmem:[%s1071_s0 + $0x10] sm:$0xff]  ;;  %v48_v18 = vrot.slane %v43_v61, %v47_v6 }
  0x14   :  { %481 = vmatprep.subr.bf16.mxu0 %v695_v20  ;;  %524 = vmatprep.subr.bf16.mxu1 %v697_v21  ;;  %v28_v55 = vld [vmem:[%s1071_s0 + $0x28] sm:$0xff]  ;;  %v30_v56 = vld [vmem:[%s1071_s0 + $0x38] sm:$0xff]  ;;  %v27_v1 = vld [vmem:[%s1071_s0 + $0x20] sm:$0xff] }
  0x15   :  { %v32_v57 = vadd.f32 %v28_v55, %v24_v51  ;;  %v34_v58 = vadd.f32 %v30_v56, %v26_v54  ;;  %v36_v59 = vld [vmem:[%s1072_s1 + $0x8] sm:$0xff]  ;;  %v38_v60 = vld [vmem:[%s1072_s1 + $0x18] sm:$0xff]  ;;  %v29_v4 = vld [vmem:[%s1071_s0 + $0x30] sm:$0xff]  ;;  %v31_v7 = vadd.f32 %v27_v1, %v23_v63 }
  0x16   :  { %v741_v5 = vld [vmem:[%s1070_s3 + $0x160] ss:$16 sps:$4 sm:$0xff]   ;;  %v33_v8 = vadd.f32 %v29_v4, %v25_v0  ;;  %v742_v9 = vld [vmem:[%s1070_s3 + $0x168] ss:$16 sps:$4 sm:$0xff]   ;;  %v743_v14 = vld [vmem:[%s1070_s3 + $0x144] ss:$16 sps:$4 sm:$0xff]  }
  0x17   :  { %482 = vmatpush1.bf16.msra.mxu0 %v699_v22  ;;  %525 = vmatpush1.bf16.msra.mxu1 %v700_v23  ;;  %v40_v2 = vadd.f32 %v36_v59, %v32_v57  ;;  %v42_v3 = vadd.f32 %v38_v60, %v34_v58  ;;  %v35_v12 = vld [vmem:[%s1072_s1] sm:$0xff]  ;;  %v37_v13 = vld [vmem:[%s1072_s1 + $0x10] sm:$0xff]  ;;  %v745_v15 = vld [vmem:[%s1070_s3 + $0x14c] ss:$16 sps:$4 sm:$0xff]  }
  0x18   :  { %483 = vmatprep.subr.bf16.mxu0 %v701_v24  ;;  %526 = vmatprep.subr.bf16.mxu1 %v703_v25  ;;  %v39_v19 = vadd.f32 %v35_v12, %v31_v7  ;;  %v41_v20 = vadd.f32 %v37_v13, %v33_v8  ;;  %v747_v21 = vld [vmem:[%s1070_s3 + $0x140] ss:$16 sps:$4 sm:$0xff]   ;;  %v748_v22 = vld [vmem:[%s1070_s3 + $0x148] ss:$16 sps:$4 sm:$0xff]   ;;  %v749_v24 = vld [vmem:[%s1070_s3 + $0x124] ss:$16 sps:$4 sm:$0xff]  }
  0x19   :  { %v56_v10 = vadd.f32 %v52_v62, %v40_v2  ;;  %v58_v11 = vadd.f32 %v52_v62, %v42_v3  ;;  %v751_v25 = vld [vmem:[%s1070_s3 + $0x12c] ss:$16 sps:$4 sm:$0xff]   ;;  %v129_v38 = vld [vmem:[%s1074_s4] sm:$0xf]  ;;  %v563_v2 = vld [vmem:[%s1075_s5 + $0x30] sm:$0xff] }
  0x1a   :  { %v560_v57 = vld [vmem:[%s1075_s5 + $0x18] sm:$0xff]  ;;  %v561_v59 = vld [vmem:[%s1075_s5 + $0x20] sm:$0xff]  ;;  %v562_v4 = vld [vmem:[%s1075_s5 + $0x28] sm:$0xff] }
  0x1b   :  { %484 = vmatpush1.bf16.msra.mxu0 %v705_v26  ;;  %527 = vmatpush1.bf16.msra.mxu1 %v706_v27  ;;  %v60_v16 = vmax.f32 %v56_v10, 0.0  ;;  %v62_v17 = vmax.f32 %v58_v11, 0.0  ;;  %v55_v26 = vadd.f32 %v48_v18, %v39_v19  ;;  %v57_v27 = vadd.f32 %v48_v18, %v41_v20  ;;  %v564_v11 = vld [vmem:[%s1075_s5 + $0x38] sm:$0xff] }
  0x1c   :  { %485 = vmatprep.subr.bf16.mxu0 %v707_v28  ;;  %528 = vmatprep.subr.bf16.mxu1 %v709_v29  ;;  %v753_v28 = vld [vmem:[%s1070_s3 + $0x120] ss:$16 sps:$4 sm:$0xff]   ;;  %v754_v29 = vld [vmem:[%s1070_s3 + $0x128] ss:$16 sps:$4 sm:$0xff]  }
  0x1d   :  { %v64_v23 = vpack.c.bf16 %v62_v17, %v60_v16 }
  0x1f   :  { %486 = vmatpush1.bf16.msra.mxu0 %v711_v30  ;;  %529 = vmatpush1.bf16.msra.mxu1 %v712_v31  ;;  %v755_v30 = vld [vmem:[%s1070_s3 + $0x104] ss:$16 sps:$4 sm:$0xff]   ;;  %v757_v31 = vld [vmem:[%s1070_s3 + $0x10c] ss:$16 sps:$4 sm:$0xff]  }
  0x20   :  { %487 = vmatprep.subr.bf16.mxu0 %v713_v32  ;;  %530 = vmatprep.subr.bf16.mxu1 %v715_v33  ;;  %v59_v32 = vmax.f32 %v55_v26, 0.0  ;;  %v61_v33 = vmax.f32 %v57_v27, 0.0 }
  0x21   :  { %503 = vmatprep.mubr.bf16.mxu0 %v64_v23  ;;  %546 = vmatprep.mubr.bf16.mxu1 %v64_v23 }
  0x23   :  { %488 = vmatpush2.bf16.msra.mxu0 %v717_v34  ;;  %531 = vmatpush2.bf16.msra.mxu1 %v718_v35  ;;  %v759_v34 = vld [vmem:[%s1070_s3 + $0x100] ss:$16 sps:$4 sm:$0xff]   ;;  %v760_v35 = vld [vmem:[%s1070_s3 + $0x108] ss:$16 sps:$4 sm:$0xff]  }
  0x24   :  { %489 = vmatprep.subr.bf16.mxu0 %v719_v36  ;;  %532 = vmatprep.subr.bf16.mxu1 %v721_v37  ;;  %v63_v36 = vpack.c.bf16 %v61_v33, %v59_v32  ;;  %v141_v37 = vsub.s32 2, %v922_v43 }
  0x27   :  { %490 = vmatpush2.bf16.msra.mxu0 %v723_v39  ;;  %533 = vmatpush2.bf16.msra.mxu1 %v724_v40  ;;  %v145_v39 = vsub.s32 3, %v922_v43  ;;  %v134_v40 = vrot.slane %v129_v38, %v47_v6 }
  0x28   :  { %491 = vmatprep.subr.bf16.mxu0 %v725_v41  ;;  %534 = vmatprep.subr.bf16.mxu1 %v727_v42  ;;  %v142_v41 = vrot.slane %v129_v38, %v141_v37  ;;  %v138_v42 = vrot.slane %v129_v38, %v51_v48 }
  0x2b   :  { %492 = vmatpush2.bf16.msra.mxu0 %v729_v44  ;;  %535 = vmatpush2.bf16.msra.mxu1 %v730_v45  ;;  %v146_v44 = vrot.slane %v129_v38, %v145_v39 }
  0x2c   :  { %493 = vmatprep.subr.bf16.mxu0 %v731_v46  ;;  %536 = vmatprep.subr.bf16.mxu1 %v733_v47  ;;  %v557_v46 = vld [vmem:[%s1075_s5] sm:$0xff] }
  0x2f   :  { %494 = vmatpush2.bf16.msra.mxu0 %v735_v49  ;;  %537 = vmatpush2.bf16.msra.mxu1 %v736_v50  ;;  %v559_v49 = vld [vmem:[%s1075_s5 + $0x10] sm:$0xff] }
  0x30   :  { %495 = vmatprep.subr.bf16.mxu0 %v737_v52  ;;  %538 = vmatprep.subr.bf16.mxu1 %v739_v53  ;;  %v558_v53 = vld [vmem:[%s1075_s5 + $0x8] sm:$0xff] }
  0x33   :  { %496 = vmatpush2.bf16.msra.mxu0 %v741_v5  ;;  %539 = vmatpush2.bf16.msra.mxu1 %v742_v9 }
  0x34   :  { %497 = vmatprep.subr.bf16.mxu0 %v743_v14  ;;  %540 = vmatprep.subr.bf16.mxu1 %v745_v15 }
  0x37   :  { %498 = vmatpush2.bf16.msra.mxu0 %v747_v21  ;;  %541 = vmatpush2.bf16.msra.mxu1 %v748_v22 }
  0x38   :  { %499 = vmatprep.subr.bf16.mxu0 %v749_v24  ;;  %542 = vmatprep.subr.bf16.mxu1 %v751_v25 }
  0x3b   :  { %500 = vmatpush2.bf16.msra.mxu0 %v753_v28  ;;  %543 = vmatpush2.bf16.msra.mxu1 %v754_v29 }
  0x3c   :  { %501 = vmatprep.subr.bf16.mxu0 %v755_v30  ;;  %544 = vmatprep.subr.bf16.mxu1 %v757_v31 }
  0x3f   :  { %502 = vmatpush2.bf16.msra.mxu0 %v759_v34  ;;  %545 = vmatpush2.bf16.msra.mxu1 %v760_v35 }
  0x42   :  { %504 = vmatmul.mubr.bf16.vlgmr.msra.gmra.mxu0 %v63_v36  ;;  %547 = vmatmul.mubr.bf16.vlgmr.msra.gmra.mxu1 %v63_v36 }
 0x102   :  { %v505_v45 = vpop.f32.mrf.mxu0  ;;  %v548_v47 = vpop.f32.mrf.mxu1 }
 0x103   :  { %v506_v50 = vadd.f32 %v505_v45, %v134_v40  ;;  %v549_v51 = vadd.f32 %v548_v47, %v142_v41 }
 0x104   :  { %v507_v52 = vpop.f32.mrf.mxu0  ;;  %v550_v43 = vpop.f32.mrf.mxu1 }
 0x105   :  { %v565_v48 = vsub.f32 %v557_v46, %v506_v50  ;;  %v567_v54 = vsub.f32 %v559_v49, %v549_v51  ;;  %v508_v55 = vadd.f32 %v507_v52, %v138_v42  ;;  %v551_v56 = vadd.f32 %v550_v43, %v146_v44 }
 0x106   :  { %v509_v58 = vpop.f32.mrf.mxu0  ;;  %v552_v60 = vpop.f32.mrf.mxu1 }
 0x107   :  { %v566_v61 = vsub.f32 %v558_v53, %v508_v55  ;;  %v510_v62 = vadd.f32 %v509_v58, %v134_v40  ;;  %v573_v63 = vand.u32 2147483647, %v565_v48  ;;  %v575_v0 = vand.u32 2147483647, %v567_v54 }
 0x108   :  { %v553_v1 = vadd.f32 %v552_v60, %v142_v41  ;;  %v511_v3 = vpop.f32.mrf.mxu0  ;;  %v554_v5 = vpop.f32.mrf.mxu1  ;;  %v568_v6 = vsub.f32 %v560_v57, %v551_v56 }
 0x109   :  { %v574_v7 = vand.u32 2147483647, %v566_v61  ;;  %v569_v8 = vsub.f32 %v561_v59, %v510_v62  ;;  %v512_v9 = vadd.f32 %v511_v3, %v138_v42  ;;  %v555_v10 = vadd.f32 %v554_v5, %v146_v44 }
 0x10a   :  { %v571_v12 = vsub.f32 %v563_v2, %v553_v1  ;;  %v576_v15 = vand.u32 2147483647, %v568_v6 }
 0x10b   :  { %v570_v13 = vsub.f32 %v562_v4, %v512_v9  ;;  %v581_v14 = vadd.f32 %v574_v7, %v573_v63  ;;  %v577_v16 = vand.u32 2147483647, %v569_v8  ;;  %v572_v18 = vsub.f32 %v564_v11, %v555_v10 }
 0x10c   :  { %v579_v20 = vand.u32 2147483647, %v571_v12 }
 0x10d   :  { %v578_v17 = vand.u32 2147483647, %v570_v13  ;;  %v582_v19 = vadd.f32 %v581_v14, %v575_v0  ;;  %v580_v23 = vand.u32 2147483647, %v572_v18 }
 0x10f   :  { %v586_v21 = vadd.f32 %v578_v17, %v577_v16  ;;  %v583_v22 = vadd.f32 %v582_v19, %v576_v15 }
 0x111   :  { %584 = vadd.xlane.f32.xlu0 %v583_v22  ;;  %v587_v24 = vadd.f32 %v586_v21, %v579_v20 }
 0x113   :  { %v588_v25 = vadd.f32 %v587_v24, %v580_v23 }
 0x115   :  { %589 = vadd.xlane.f32.xlu0 %v588_v25 }
 0x19a   :  { %v585_v26 = vpop.xlane.xlu0 %584 }
 0x19b   :  { %v592_v27 = vmul.f32 0.001953125, %v585_v26 }
 0x19d   :  { %595 = vst.msk [vmem:[%s1076_s6] sm:$0xff] %vm594_vm0, %v592_v27 }
 0x19e   :  { %v590_v28 = vpop.xlane.xlu0 %589 }
 0x19f   :  { %v593_v29 = vmul.f32 0.001953125, %v590_v28 }
 0x1a1   :  { %596 = vst.msk [vmem:[%s1076_s6 + $0x8] sm:$0xff] %vm594_vm0, %v593_v29 }

// kernel: gaussian_diffusion_loss.2
= control target key start
LH: loop header
LB: loop body
LE: loop exit
PB: predicated region body
PF: predicated region fallthrough
CT: control target
= control target key end

     0   :  { %11 = vsyncpa [#allocation3], 0  ;;  %s5720_s0 = inlined_call_operand.vmem [shape: bf16[16,3072], index: 0, kind: input, shape index: {}]   ;;  %s5721_s1 = inlined_call_operand.hbm [shape: bf16[3072,512], index: 1, kind: input, shape index: {}]   ;;  %s5722_s2 = inlined_call_operand.vmem [shape: f32[16,1], index: 2, kind: input, shape index: {}]   ;;  %s5723_s3 = inlined_call_operand.vmem [shape: f32[16,1], index: 3, kind: input, shape index: {}]   ;;  %s5724_s4 = inlined_call_operand.vmem [shape: f32[16,512], index: 4, kind: input, shape index: {}]   ;;  %s5725_s5 = inlined_call_operand.hbm [shape: bf16[512,256], index: 5, kind: input, shape index: {}]   ;;  %s5726_s6 = inlined_call_operand.vmem [shape: f32[2,16,256], index: 6, kind: output, shape index: {}]  }
   0x1   :  { %13 = vsyncpa [#allocation3 + $0x1], 0 }
   0x2   :  { %14 = vsyncpa [#allocation6], 0 }
   0x3   :  { %16 = vsyncpa [#allocation6 + $0x1], 0  ;;  %s4980_s21 = smov 0   ;;  %s4982_s22 = smov 0  }
   0x4   :  { %s4984_s23 = smov 0   ;;  %s4986_s24 = smov 0  }
   0x5 LB: > { %s4999_s25 = sadd.s32 4294967295, %s4937_s24   ;;  %s5002_s26 = sadd.s32 1, %s4937_s24   ;;  %s4937_s24 = sphi %s4986_s24, %s5732_s24   ;;  %s4933_s23 = sphi %s4984_s23, %s5731_s23   ;;  %s4929_s22 = sphi %s4982_s22, %s5730_s22   ;;  %s4925_s21 = sphi %s4980_s21, %s5729_s21  }
   0x6   : > { %s47_s27 = ssub.s32 %s4937_s24, %s5002_s26  ;;  %s50_s28 = sadd.s32 1, %s4933_s23 }
   0x7   : > { %p48_p0 = scmp.eq.s32.totalorder %s47_s27, 0  ;;  %p57_p1 = scmp.ne.s32.totalorder %s4933_s23, %s4929_s22 }
   0x8   : > { %p58_p2 = scmp.eq.s32.totalorder %s4937_s24, 0  ;;  %p63_p3 = scmp.ne.s32.totalorder %s4929_s22, %s4925_s21 }
   0x9   : > { %s5012_s29 = scalar_select %p48_p0, %s4933_s23, %s50_s28  }
   0xa   : > { %p5014_p4 = por %p58_p2, %p57_p1  ;;  %p64_p5 = scmp.eq.s32.totalorder %s4999_s25, 0 }
   0xb   : > { %p3717_p7 = scmp.ge.s32.totalorder %s4937_s24, 2 }
   0xc   : > { %p5019_p6 = por %p64_p5, %p63_p3  ;;  %s5025_s8 = sand.u32 (!%p3717_p7), 1, %s4933_s23  }
   0xd   : > { %212 = sbr.rel (%p3717_p7) target bundleno = 68 (0x44), region = 28  ;;  %s4174_s9 = sshll.u32 (!%p3717_p7), %s4937_s24, 7 }
   0xe   : > { %s4179_s10 = smul.u32 (!%p3717_p7), 3072, %s5025_s8  ;;  %s5032_s13 = scalar_lea.hbm (!%p3717_p7), %s5721_s1, %s4174_s9 }
   0xf   : > { %s217_s16 = scalar_lea.sflag (!%p3717_p7), [#allocation3], %s5025_s8  ;;  %s4847_s17 = scalar_lea.hbm (!%p3717_p7), %s5032_s13, 49152 }
  0x10   : > { %s220_s14 = scalar_lea.vmem (!%p3717_p7), [#allocation2], %s4179_s10  ;;  %p4848_p8 = scmp.ne.s32.totalorder (!%p3717_p7), %s5032_s13, %s4847_s17 }
  0x11   : > { %s227_s15 = sshll.u32 (!%p3717_p7), %s220_s14, 4  ;;  %s4851_s20 = scalar_lea.hbm (!%p3717_p7), %s5721_s1, 98304  ;;  %s5034_s15 = int_to_ptr.vmem [resolvable:$true] %s227_s15 }
  0x12   : > { %p4849_p9 = pnand %p4848_p8, %p5014_p4  ;;  %p4852_p11 = scmp.lt.s32.totalorder %s5032_s13, %s5721_s1 }
  0x13   : > { %p4853_p12 = scmp.lt.s32.totalorder %s4851_s20, %s4847_s17 }
  0x14   : > { %p4850_p10 = pneg %p4849_p9 }
  0x15   : > { %p4854_p13 = por %p4853_p12, %p4852_p11 }
  0x17   : > { %p4855_p0 = pnand %p4854_p13, %p4850_p10 }
  0x19   : > { %4858 = shalt.err (!%p4855_p0)
}
  0x1a   : > { %s4859_s28 = scalar_lea.vmem %s5034_s15, 49152  ;;  %s4939_s9 = smov [#allocation2]  }
  0x1b   : > { %p4860_p1 = scmp.ne.s32.totalorder %s5034_s15, %s4859_s28  ;;  %s4863_s10 = sshll.u32 %s4939_s9, 4  ;;  %s4864_s10 = int_to_ptr.vmem [resolvable:$false] %s4863_s10 }
  0x1c   : > { %s4865_s11 = scalar_lea.vmem %s4864_s10, 98304  ;;  %p4866_p5 = scmp.lt.s32.totalorder %s5034_s15, %s4864_s10 }
  0x1d   : > { %p4861_p2 = pnand %p4860_p1, %p5014_p4  ;;  %p4867_p7 = scmp.lt.s32.totalorder %s4865_s11, %s4859_s28 }
  0x1f   : > { %p4862_p3 = pneg %p4861_p2  ;;  %p4868_p8 = por %p4867_p7, %p4866_p5 }
  0x21   : > { %p4869_p9 = pnand %p4868_p8, %p4862_p3 }
  0x23   : > { %4872 = shalt.err (!%p4869_p9)
}
  0x24   : > { %s4940_s12 = smov 256   ;;  %s4941_s14 = smov 128  }
  0x25   : > { %s4942_s17 = smov 8   ;;  %236 = sbr.rel (!%p5014_p4) target bundleno = 44 (0x2c), region = 36 }
  0x26   : > { %4181 = dma.hbm_to_vmem [thread:$0]  (%p5014_p4), %s5032_s13, 49152, %s5034_s15, %s217_s16, %s4940_s12, %s4941_s14, %s4942_s17  }
  0x27   : > { %s3720_s18 = sshll.u32 (%p5014_p4), %s5025_s8, 5  ;;  %s4175_s19 = sshll.u32 (%p5014_p4), %s4937_s24, 4 }
  0x28   : > { %s243_s27 = scalar_lea.vmem (%p5014_p4), %s5724_s4, %s4175_s19  ;;  %s240_s28 = scalar_lea.vmem (%p5014_p4), [#allocation4], %s3720_s18 }
  0x29   : > { %v256_v0 = vld [vmem:[%s243_s27] sm:$0xff] (%p5014_p4)  ;;  %v258_v1 = vld [vmem:[%s243_s27 + $0x8] sm:$0xff] (%p5014_p4) }
  0x2a   : > { %v260_v2 = vld [vmem:[%s243_s27 + $0x20] sm:$0xff]  ;;  %257 = vst [vmem:[%s240_s28] sm:$0xff] %v256_v0  ;;  %259 = vst [vmem:[%s240_s28 + $0x8] sm:$0xff] %v258_v1  ;;  %v262_v3 = vld [vmem:[%s243_s27 + $0x28] sm:$0xff] }
  0x2b   : > { %261 = vst [vmem:[%s240_s28 + $0x10] sm:$0xff] %v260_v2  ;;  %263 = vst [vmem:[%s240_s28 + $0x18] sm:$0xff] %v262_v3 }
  0x2c PF: > { %s3723_s13 = sshll.u32 %s5025_s8, 8  ;;  %s4177_s15 = sshll.u32 %s4937_s24, 12 }
  0x2d   : > { %s5073_s10 = scalar_lea.hbm %s5725_s5, %s4177_s15  ;;  %s274_s11 = scalar_lea.vmem [#allocation5], %s3723_s13 }
  0x2e   : > { %s282_s12 = sshll.u32 %s274_s11, 4  ;;  %s271_s18 = scalar_lea.sflag [#allocation6], %s5025_s8  ;;  %s5075_s12 = int_to_ptr.vmem [resolvable:$true] %s282_s12 }
  0x2f   : > { %s4873_s19 = scalar_lea.hbm %s5073_s10, 4096  ;;  %s4877_s27 = scalar_lea.hbm %s5725_s5, 8192 }
  0x30   : > { %p4874_p10 = scmp.ne.s32.totalorder %s5073_s10, %s4873_s19  ;;  %p4878_p13 = scmp.lt.s32.totalorder %s5073_s10, %s5725_s5 }
  0x31   : > { %p4879_p0 = scmp.lt.s32.totalorder %s4877_s27, %s4873_s19 }
  0x32   : > { %p4875_p11 = pnand %p4874_p10, %p5014_p4 }
  0x33   : > { %p4880_p1 = por %p4879_p0, %p4878_p13 }
  0x34   : > { %p4876_p12 = pneg %p4875_p11 }
  0x36   : > { %p4881_p2 = pnand %p4880_p1, %p4876_p12 }
  0x38   : > { %4884 = shalt.err (!%p4881_p2)
}
  0x39   : > { %s4885_s8 = scalar_lea.vmem %s5075_s12, 4096  ;;  %s4943_s13 = smov [#allocation5]  }
  0x3a   : > { %p4886_p3 = scmp.ne.s32.totalorder %s5075_s12, %s4885_s8  ;;  %s4889_s16 = sshll.u32 %s4943_s13, 4  ;;  %s4890_s16 = int_to_ptr.vmem [resolvable:$false] %s4889_s16 }
  0x3b   : > { %s4891_s9 = scalar_lea.vmem %s4890_s16, 8192  ;;  %p4892_p8 = scmp.lt.s32.totalorder %s5075_s12, %s4890_s16 }
  0x3c   : > { %p4887_p5 = pnand %p4886_p3, %p5014_p4  ;;  %p4893_p9 = scmp.lt.s32.totalorder %s4891_s9, %s4885_s8 }
  0x3e   : > { %p4888_p7 = pneg %p4887_p5  ;;  %p4894_p10 = por %p4893_p9, %p4892_p8 }
  0x40   : > { %p4895_p11 = pnand %p4894_p10, %p4888_p7 }
  0x42   : > { %4898 = shalt.err (!%p4895_p11)
}
  0x43   : > { %4182 = dma.hbm_to_vmem [thread:$0]  (%p5014_p4), %s5073_s10, 4096, %s5075_s12, %s271_s18, %s4941_s14, %s4941_s14, %s4942_s17  }
  0x44 PF: > { %p3727_p12 = scmp.ge.s32.totalorder %s4937_s24, 1  ;;  %p290_p13 = scmp.lt.s32.totalorder %s4937_s24, 3 }
  0x46   : > { %p291_p0 = pnand %p3727_p12, %p290_p13 }
  0x47   : > { %s296_s11 = sand.u32 (!%p291_p0), 1, %s4929_s22  }
  0x48   : > { %294 = sbr.rel (%p291_p0) target bundleno = 877 (0x36d), region = 63  ;;  %s297_s20 = scalar_lea.sflag (!%p291_p0), [#allocation3], %s296_s11 }
  0x49   : > { %s4180_s19 = smul.u32 (!%p291_p0), 3072, %s296_s11 }
  0x4b   : > { %s5104_s21 = scalar_lea.vmem (!%p291_p0), [#allocation2], %s4180_s19 }
  0x4d   : > { %4916 = dma.done.wait (%p5019_p6), %s297_s20, 49152  }
  0x4e   : > { %4918 = vsyncadd (%p5019_p6), %s297_s20, 4294918144  ;;  %s3728_s30 = sshll.u32 %s296_s11, 5  ;;  %s3729_s14 = sshll.u32 %s296_s11, 8 }
  0x4f   : > { %s5110_s17 = scalar_lea.vmem [#allocation4], %s3728_s30  ;;  %s313_s24 = scalar_lea.sflag [#allocation6], %s296_s11 }
  0x50   : > { %s5112_s10 = scalar_lea.vmem [#allocation5], %s3729_s14 }
  0x51   : > { %4920 = dma.done.wait (%p5019_p6), %s313_s24, 4096  }
  0x52   : > { %4922 = vsyncadd (%p5019_p6), %s313_s24, 4294963200  ;;  %v4223_v4 = vld [vmem:[%s5104_s21 + $0x74] ss:$8 sps:$4 sm:$0xff]   ;;  %v4227_v6 = vld [vmem:[%s5104_s21 + $0x70] ss:$8 sps:$4 sm:$0xff]   ;;  %p357_p4 = scmp.lt.s32.totalorder %s4999_s25, 1 }
  0x53   : > { %v4225_v5 = vld [vmem:[%s5104_s21 + $0x174] ss:$8 sps:$4 sm:$0xff]   ;;  %2810 = vmatprep.subr.bf16.mxu0 %v4223_v4  ;;  %v4228_v7 = vld [vmem:[%s5104_s21 + $0x170] ss:$8 sps:$4 sm:$0xff]   ;;  %v4229_v8 = vld [vmem:[%s5104_s21 + $0x64] ss:$8 sps:$4 sm:$0xff]  }
  0x54   : > { %2853 = vmatprep.subr.bf16.mxu1 %v4225_v5  ;;  %2811 = vmatpush1.bf16.msra.mxu0 %v4227_v6  ;;  %v4231_v9 = vld [vmem:[%s5104_s21 + $0x164] ss:$8 sps:$4 sm:$0xff]   ;;  %v4233_v10 = vld [vmem:[%s5104_s21 + $0x60] ss:$8 sps:$4 sm:$0xff]   ;;  %v4235_v12 = vld [vmem:[%s5104_s21 + $0x54] ss:$8 sps:$4 sm:$0xff]  }
  0x55   : > { %2854 = vmatpush1.bf16.msra.mxu1 %v4228_v7  ;;  %2812 = vmatprep.subr.bf16.mxu0 %v4229_v8  ;;  %v4234_v11 = vld [vmem:[%s5104_s21 + $0x160] ss:$8 sps:$4 sm:$0xff]   ;;  %v4237_v13 = vld [vmem:[%s5104_s21 + $0x154] ss:$8 sps:$4 sm:$0xff]   ;;  %v4239_v14 = vld [vmem:[%s5104_s21 + $0x50] ss:$8 sps:$4 sm:$0xff]  }
  0x56   : > { %2855 = vmatprep.subr.bf16.mxu1 %v4231_v9  ;;  %v4240_v15 = vld [vmem:[%s5104_s21 + $0x150] ss:$8 sps:$4 sm:$0xff]   ;;  %v4241_v16 = vld [vmem:[%s5104_s21 + $0x44] ss:$8 sps:$4 sm:$0xff]   ;;  %v4245_v18 = vld [vmem:[%s5104_s21 + $0x40] ss:$8 sps:$4 sm:$0xff]  }
  0x57   : > { %v4243_v17 = vld [vmem:[%s5104_s21 + $0x144] ss:$8 sps:$4 sm:$0xff]   ;;  %v4246_v19 = vld [vmem:[%s5104_s21 + $0x140] ss:$8 sps:$4 sm:$0xff]   ;;  %v4247_v20 = vld [vmem:[%s5104_s21 + $0x34] ss:$8 sps:$4 sm:$0xff]  }
  0x58   : > { %2813 = vmatpush1.bf16.msra.mxu0 %v4233_v10  ;;  %v4249_v21 = vld [vmem:[%s5104_s21 + $0x134] ss:$8 sps:$4 sm:$0xff]   ;;  %v4251_v22 = vld [vmem:[%s5104_s21 + $0x30] ss:$8 sps:$4 sm:$0xff]   ;;  %v4253_v24 = vld [vmem:[%s5104_s21 + $0x24] ss:$8 sps:$4 sm:$0xff]  }
  0x59   : > { %2856 = vmatpush1.bf16.msra.mxu1 %v4234_v11  ;;  %2814 = vmatprep.subr.bf16.mxu0 %v4235_v12  ;;  %v4252_v23 = vld [vmem:[%s5104_s21 + $0x130] ss:$8 sps:$4 sm:$0xff]   ;;  %v4255_v25 = vld [vmem:[%s5104_s21 + $0x124] ss:$8 sps:$4 sm:$0xff]   ;;  %v4257_v26 = vld [vmem:[%s5104_s21 + $0x20] ss:$8 sps:$4 sm:$0xff]  }
  0x5a   : > { %2857 = vmatprep.subr.bf16.mxu1 %v4237_v13  ;;  %v4258_v27 = vld [vmem:[%s5104_s21 + $0x120] ss:$8 sps:$4 sm:$0xff]   ;;  %v4259_v28 = vld [vmem:[%s5104_s21 + $0x14] ss:$8 sps:$4 sm:$0xff]   ;;  %v4263_v30 = vld [vmem:[%s5104_s21 + $0x10] ss:$8 sps:$4 sm:$0xff]  }
  0x5b   : > { %v4261_v29 = vld [vmem:[%s5104_s21 + $0x114] ss:$8 sps:$4 sm:$0xff]   ;;  %v4264_v31 = vld [vmem:[%s5104_s21 + $0x110] ss:$8 sps:$4 sm:$0xff]   ;;  %v4265_v32 = vld [vmem:[%s5104_s21 + $0x4] ss:$8 sps:$4 sm:$0xff]  }
  0x5c   : > { %2815 = vmatpush1.bf16.msra.mxu0 %v4239_v14  ;;  %v4267_v33 = vld [vmem:[%s5104_s21 + $0x104] ss:$8 sps:$4 sm:$0xff]   ;;  %v4269_v34 = vld [vmem:[%s5104_s21] ss:$8 sps:$4 sm:$0xff]   ;;  %v4271_v36 = vld [vmem:[%s5104_s21 + $0xf4] ss:$8 sps:$4 sm:$0xff]  }
  0x5d   : > { %2858 = vmatpush1.bf16.msra.mxu1 %v4240_v15  ;;  %2816 = vmatprep.subr.bf16.mxu0 %v4241_v16  ;;  %v4270_v35 = vld [vmem:[%s5104_s21 + $0x100] ss:$8 sps:$4 sm:$0xff]   ;;  %v4273_v37 = vld [vmem:[%s5104_s21 + $0x1f4] ss:$8 sps:$4 sm:$0xff]   ;;  %v4275_v38 = vld [vmem:[%s5104_s21 + $0xf0] ss:$8 sps:$4 sm:$0xff]  }
  0x5e   : > { %2859 = vmatprep.subr.bf16.mxu1 %v4243_v17  ;;  %v4276_v39 = vld [vmem:[%s5104_s21 + $0x1f0] ss:$8 sps:$4 sm:$0xff]   ;;  %v4277_v40 = vld [vmem:[%s5104_s21 + $0xe4] ss:$8 sps:$4 sm:$0xff]   ;;  %v4281_v42 = vld [vmem:[%s5104_s21 + $0xe0] ss:$8 sps:$4 sm:$0xff]  }
  0x5f   : > { %v4279_v41 = vld [vmem:[%s5104_s21 + $0x1e4] ss:$8 sps:$4 sm:$0xff]   ;;  %v4282_v43 = vld [vmem:[%s5104_s21 + $0x1e0] ss:$8 sps:$4 sm:$0xff]   ;;  %v4283_v44 = vld [vmem:[%s5104_s21 + $0xd4] ss:$8 sps:$4 sm:$0xff]  }
  0x60   : > { %2817 = vmatpush1.bf16.msra.mxu0 %v4245_v18  ;;  %v4285_v45 = vld [vmem:[%s5104_s21 + $0x1d4] ss:$8 sps:$4 sm:$0xff]   ;;  %v4287_v46 = vld [vmem:[%s5104_s21 + $0xd0] ss:$8 sps:$4 sm:$0xff]   ;;  %v4289_v48 = vld [vmem:[%s5104_s21 + $0xc4] ss:$8 sps:$4 sm:$0xff]  }
  0x61   : > { %2860 = vmatpush1.bf16.msra.mxu1 %v4246_v19  ;;  %2818 = vmatprep.subr.bf16.mxu0 %v4247_v20  ;;  %v4288_v47 = vld [vmem:[%s5104_s21 + $0x1d0] ss:$8 sps:$4 sm:$0xff]   ;;  %v4291_v49 = vld [vmem:[%s5104_s21 + $0x1c4] ss:$8 sps:$4 sm:$0xff]   ;;  %v4293_v50 = vld [vmem:[%s5104_s21 + $0xc0] ss:$8 sps:$4 sm:$0xff]  }
  0x62   : > { %2861 = vmatprep.subr.bf16.mxu1 %v4249_v21  ;;  %v4294_v51 = vld [vmem:[%s5104_s21 + $0x1c0] ss:$8 sps:$4 sm:$0xff]   ;;  %v4295_v56 = vld [vmem:[%s5104_s21 + $0xb4] ss:$8 sps:$4 sm:$0xff]   ;;  %v4299_v60 = vld [vmem:[%s5104_s21 + $0xb0] ss:$8 sps:$4 sm:$0xff]  }
  0x63   : > { %v362_v52 = vld [vmem:[%s5720_s0] sm:$0xff]  ;;  %v363_v54 = vld [vmem:[%s5720_s0 + $0x8] sm:$0xff]  ;;  %v4297_v58 = vld [vmem:[%s5104_s21 + $0x1b4] ss:$8 sps:$4 sm:$0xff]   ;;  %s5734_s25 = smov (!%p357_p4, %s4999_s25), 1 }
  0x64   : > { %2819 = vmatpush1.bf16.msra.mxu0 %v4251_v22  ;;  %v374_v53 = vld [vmem:[%s5720_s0 + $0x60] sm:$0xff]  ;;  %v375_v55 = vld [vmem:[%s5720_s0 + $0x68] sm:$0xff]  ;;  %v4300_v61 = vld [vmem:[%s5104_s21 + $0x1b0] ss:$8 sps:$4 sm:$0xff]  }
  0x65   : > { %2862 = vmatpush1.bf16.msra.mxu1 %v4252_v23  ;;  %2820 = vmatprep.subr.bf16.mxu0 %v4253_v24  ;;  %v3733_v57 = vcombine.high %v362_v52, %v374_v53  ;;  %v3735_v59 = vcombine.high %v363_v54, %v375_v55  ;;  %v4301_v62 = vld [vmem:[%s5104_s21 + $0xa4] ss:$8 sps:$4 sm:$0xff]   ;;  %v4305_v0 = vld [vmem:[%s5104_s21 + $0xa0] ss:$8 sps:$4 sm:$0xff]   ;;  %v4307_v2 = vld [vmem:[%s5104_s21 + $0x94] ss:$8 sps:$4 sm:$0xff]   ;;  %v3732_v12 = vcombine.low %v362_v52, %v374_v53 }
  0x66   : > { %2863 = vmatprep.subr.bf16.mxu1 %v4255_v25  ;;  %v4303_v63 = vld [vmem:[%s5104_s21 + $0x1a4] ss:$8 sps:$4 sm:$0xff]   ;;  %v4306_v1 = vld [vmem:[%s5104_s21 + $0x1a0] ss:$8 sps:$4 sm:$0xff]   ;;  %v4309_v3 = vld [vmem:[%s5104_s21 + $0x194] ss:$8 sps:$4 sm:$0xff]   ;;  %v3734_v13 = vcombine.low %v363_v54, %v375_v55 }
  0x67   : > { %2842 = vmatprep.mubr.bf16.mxu0 %v3733_v57  ;;  %2885 = vmatprep.mubr.bf16.mxu1 %v3735_v59  ;;  %v4311_v4 = vld [vmem:[%s5104_s21 + $0x90] ss:$8 sps:$4 sm:$0xff]   ;;  %v4313_v6 = vld [vmem:[%s5104_s21 + $0x84] ss:$8 sps:$4 sm:$0xff]   ;;  %v4317_v8 = vld [vmem:[%s5104_s21 + $0x80] ss:$8 sps:$4 sm:$0xff]  }
  0x68   : > { %2821 = vmatpush1.bf16.msra.mxu0 %v4257_v26  ;;  %v4312_v5 = vld [vmem:[%s5104_s21 + $0x190] ss:$8 sps:$4 sm:$0xff]   ;;  %v4315_v7 = vld [vmem:[%s5104_s21 + $0x184] ss:$8 sps:$4 sm:$0xff]   ;;  %v4318_v9 = vld [vmem:[%s5104_s21 + $0x180] ss:$8 sps:$4 sm:$0xff]  }
  0x69   : > { %2864 = vmatpush1.bf16.msra.mxu1 %v4258_v27  ;;  %2822 = vmatprep.subr.bf16.mxu0 %v4259_v28  ;;  %v4321_v10 = vld [vmem:[%s5104_s21 + $0x274] ss:$8 sps:$4 sm:$0xff]   ;;  %v4319_v14 = vld [vmem:[%s5104_s21 + $0x270] ss:$8 sps:$4 sm:$0xff]   ;;  %v4327_v16 = vld [vmem:[%s5104_s21 + $0x264] ss:$8 sps:$4 sm:$0xff]  }
  0x6a   : > { %2865 = vmatprep.subr.bf16.mxu1 %v4261_v29  ;;  %v4324_v11 = vld [vmem:[%s5104_s21 + $0x374] ss:$8 sps:$4 sm:$0xff]   ;;  %v4322_v15 = vld [vmem:[%s5104_s21 + $0x370] ss:$8 sps:$4 sm:$0xff]   ;;  %v4330_v17 = vld [vmem:[%s5104_s21 + $0x364] ss:$8 sps:$4 sm:$0xff]  }
  0x6b   : > { %v4325_v18 = vld [vmem:[%s5104_s21 + $0x260] ss:$8 sps:$4 sm:$0xff]   ;;  %v4333_v20 = vld [vmem:[%s5104_s21 + $0x254] ss:$8 sps:$4 sm:$0xff]   ;;  %v4331_v22 = vld [vmem:[%s5104_s21 + $0x250] ss:$8 sps:$4 sm:$0xff]  }
  0x6c   : > { %2823 = vmatpush1.bf16.msra.mxu0 %v4263_v30  ;;  %v4328_v19 = vld [vmem:[%s5104_s21 + $0x360] ss:$8 sps:$4 sm:$0xff]   ;;  %v4336_v21 = vld [vmem:[%s5104_s21 + $0x354] ss:$8 sps:$4 sm:$0xff]   ;;  %v4334_v23 = vld [vmem:[%s5104_s21 + $0x350] ss:$8 sps:$4 sm:$0xff]  }
  0x6d   : > { %2866 = vmatpush1.bf16.msra.mxu1 %v4264_v31  ;;  %2824 = vmatprep.subr.bf16.mxu0 %v4265_v32  ;;  %v4339_v24 = vld [vmem:[%s5104_s21 + $0x244] ss:$8 sps:$4 sm:$0xff]   ;;  %v4337_v26 = vld [vmem:[%s5104_s21 + $0x240] ss:$8 sps:$4 sm:$0xff]   ;;  %v4345_v28 = vld [vmem:[%s5104_s21 + $0x234] ss:$8 sps:$4 sm:$0xff]  }
  0x6e   : > { %2867 = vmatprep.subr.bf16.mxu1 %v4267_v33  ;;  %v4342_v25 = vld [vmem:[%s5104_s21 + $0x344] ss:$8 sps:$4 sm:$0xff]   ;;  %v4340_v27 = vld [vmem:[%s5104_s21 + $0x340] ss:$8 sps:$4 sm:$0xff]   ;;  %v4348_v29 = vld [vmem:[%s5104_s21 + $0x334] ss:$8 sps:$4 sm:$0xff]  }
  0x6f   : > { %v4343_v30 = vld [vmem:[%s5104_s21 + $0x230] ss:$8 sps:$4 sm:$0xff]   ;;  %v4351_v32 = vld [vmem:[%s5104_s21 + $0x224] ss:$8 sps:$4 sm:$0xff]   ;;  %v4376_v57 = vld [vmem:[%s5104_s21 + $0x3e0] ss:$8 sps:$4 sm:$0xff]  }
  0x70   : > { %2825 = vmatpush1.bf16.msra.mxu0 %v4269_v34  ;;  %v4346_v31 = vld [vmem:[%s5104_s21 + $0x330] ss:$8 sps:$4 sm:$0xff]   ;;  %v4354_v33 = vld [vmem:[%s5104_s21 + $0x324] ss:$8 sps:$4 sm:$0xff]   ;;  %v4349_v34 = vld [vmem:[%s5104_s21 + $0x220] ss:$8 sps:$4 sm:$0xff]  }
  0x71   : > { %2868 = vmatpush1.bf16.msra.mxu1 %v4270_v35  ;;  %2826 = vmatprep.subr.bf16.mxu0 %v4271_v36  ;;  %v4352_v35 = vld [vmem:[%s5104_s21 + $0x320] ss:$8 sps:$4 sm:$0xff]   ;;  %v4357_v36 = vld [vmem:[%s5104_s21 + $0x214] ss:$8 sps:$4 sm:$0xff]   ;;  %v4367_v52 = vld [vmem:[%s5104_s21 + $0x2f0] ss:$8 sps:$4 sm:$0xff]  }
  0x72   : > { %2869 = vmatprep.subr.bf16.mxu1 %v4273_v37  ;;  %v4360_v37 = vld [vmem:[%s5104_s21 + $0x314] ss:$8 sps:$4 sm:$0xff]   ;;  %v4370_v53 = vld [vmem:[%s5104_s21 + $0x3f0] ss:$8 sps:$4 sm:$0xff]   ;;  %v4375_v54 = vld [vmem:[%s5104_s21 + $0x2e4] ss:$8 sps:$4 sm:$0xff]  }
  0x73   : > { %v4378_v55 = vld [vmem:[%s5104_s21 + $0x3e4] ss:$8 sps:$4 sm:$0xff]   ;;  %v4384_v59 = vld [vmem:[%s5104_s21 + $0x3d4] ss:$8 sps:$4 sm:$0xff]  }
  0x74   : > { %2827 = vmatpush2.bf16.msra.mxu0 %v4275_v38  ;;  %v4355_v38 = vld [vmem:[%s5104_s21 + $0x210] ss:$8 sps:$4 sm:$0xff]  }
  0x75   : > { %2870 = vmatpush2.bf16.msra.mxu1 %v4276_v39  ;;  %2828 = vmatprep.subr.bf16.mxu0 %v4277_v40  ;;  %v4358_v39 = vld [vmem:[%s5104_s21 + $0x310] ss:$8 sps:$4 sm:$0xff]  }
  0x76   : > { %2871 = vmatprep.subr.bf16.mxu1 %v4279_v41  ;;  %v5225_v40 = vld [vmem:[%s5720_s0 + $0x10] sm:$0xff] }
  0x77   : > { %v5230_v41 = vld [vmem:[%s5720_s0 + $0x70] sm:$0xff] }
  0x78   : > { %2829 = vmatpush2.bf16.msra.mxu0 %v4281_v42  ;;  %v5235_v42 = vld [vmem:[%s5720_s0 + $0x18] sm:$0xff] }
  0x79   : > { %2872 = vmatpush2.bf16.msra.mxu1 %v4282_v43  ;;  %2830 = vmatprep.subr.bf16.mxu0 %v4283_v44  ;;  %v5240_v43 = vld [vmem:[%s5720_s0 + $0x78] sm:$0xff]  ;;  %v4363_v44 = vld [vmem:[%s5104_s21 + $0x204] ss:$8 sps:$4 sm:$0xff]  }
  0x7a   : > { %2873 = vmatprep.subr.bf16.mxu1 %v4285_v45  ;;  %v3737_v45 = vcombine.high %v5225_v40, %v5230_v41 }
  0x7c   : > { %2831 = vmatpush2.bf16.msra.mxu0 %v4287_v46  ;;  %v4366_v46 = vld [vmem:[%s5104_s21 + $0x304] ss:$8 sps:$4 sm:$0xff]  }
  0x7d   : > { %2874 = vmatpush2.bf16.msra.mxu1 %v4288_v47  ;;  %2832 = vmatprep.subr.bf16.mxu0 %v4289_v48  ;;  %v3739_v47 = vcombine.high %v5235_v42, %v5240_v43  ;;  %v4361_v48 = vld [vmem:[%s5104_s21 + $0x200] ss:$8 sps:$4 sm:$0xff]  }
  0x7e   : > { %2875 = vmatprep.subr.bf16.mxu1 %v4291_v49  ;;  %v4364_v49 = vld [vmem:[%s5104_s21 + $0x300] ss:$8 sps:$4 sm:$0xff]  }
  0x80   : > { %2833 = vmatpush2.bf16.msra.mxu0 %v4293_v50  ;;  %v4369_v50 = vld [vmem:[%s5104_s21 + $0x2f4] ss:$8 sps:$4 sm:$0xff]  }
  0x81   : > { %2876 = vmatpush2.bf16.msra.mxu1 %v4294_v51  ;;  %2834 = vmatprep.subr.bf16.mxu0 %v4295_v56  ;;  %v4372_v51 = vld [vmem:[%s5104_s21 + $0x3f4] ss:$8 sps:$4 sm:$0xff]   ;;  %v4373_v56 = vld [vmem:[%s5104_s21 + $0x2e0] ss:$8 sps:$4 sm:$0xff]  }
  0x82   : > { %2877 = vmatprep.subr.bf16.mxu1 %v4297_v58  ;;  %v4381_v58 = vld [vmem:[%s5104_s21 + $0x2d4] ss:$8 sps:$4 sm:$0xff]  }
  0x84   : > { %2835 = vmatpush2.bf16.msra.mxu0 %v4299_v60  ;;  %v4379_v60 = vld [vmem:[%s5104_s21 + $0x2d0] ss:$8 sps:$4 sm:$0xff]  }
  0x85   : > { %2878 = vmatpush2.bf16.msra.mxu1 %v4300_v61  ;;  %2836 = vmatprep.subr.bf16.mxu0 %v4301_v62  ;;  %v4382_v61 = vld [vmem:[%s5104_s21 + $0x3d0] ss:$8 sps:$4 sm:$0xff]   ;;  %v4387_v62 = vld [vmem:[%s5104_s21 + $0x2c4] ss:$8 sps:$4 sm:$0xff]  }
  0x86   : > { %2879 = vmatprep.subr.bf16.mxu1 %v4303_v63  ;;  %v4390_v63 = vld [vmem:[%s5104_s21 + $0x3c4] ss:$8 sps:$4 sm:$0xff]  }
  0x88   : > { %2837 = vmatpush2.bf16.msra.mxu0 %v4305_v0  ;;  %v4385_v0 = vld [vmem:[%s5104_s21 + $0x2c0] ss:$8 sps:$4 sm:$0xff]  }
  0x89   : > { %2880 = vmatpush2.bf16.msra.mxu1 %v4306_v1  ;;  %2838 = vmatprep.subr.bf16.mxu0 %v4307_v2  ;;  %v4388_v1 = vld [vmem:[%s5104_s21 + $0x3c0] ss:$8 sps:$4 sm:$0xff]   ;;  %v4393_v2 = vld [vmem:[%s5104_s21 + $0x2b4] ss:$8 sps:$4 sm:$0xff]  }
  0x8a   : > { %2881 = vmatprep.subr.bf16.mxu1 %v4309_v3  ;;  %v4396_v3 = vld [vmem:[%s5104_s21 + $0x3b4] ss:$8 sps:$4 sm:$0xff]  }
  0x8c   : > { %2839 = vmatpush2.bf16.msra.mxu0 %v4311_v4  ;;  %v4391_v4 = vld [vmem:[%s5104_s21 + $0x2b0] ss:$8 sps:$4 sm:$0xff]  }
  0x8d   : > { %2882 = vmatpush2.bf16.msra.mxu1 %v4312_v5  ;;  %2840 = vmatprep.subr.bf16.mxu0 %v4313_v6  ;;  %v4394_v5 = vld [vmem:[%s5104_s21 + $0x3b0] ss:$8 sps:$4 sm:$0xff]   ;;  %v4399_v6 = vld [vmem:[%s5104_s21 + $0x2a4] ss:$8 sps:$4 sm:$0xff]  }
  0x8e   : > { %2883 = vmatprep.subr.bf16.mxu1 %v4315_v7  ;;  %v4402_v7 = vld [vmem:[%s5104_s21 + $0x3a4] ss:$8 sps:$4 sm:$0xff]  }
  0x90   : > { %2841 = vmatpush2.bf16.msra.mxu0 %v4317_v8  ;;  %v4397_v8 = vld [vmem:[%s5104_s21 + $0x2a0] ss:$8 sps:$4 sm:$0xff]  }
  0x91   : > { %2884 = vmatpush2.bf16.msra.mxu1 %v4318_v9  ;;  %2896 = vmatprep.subr.bf16.mxu0 %v4321_v10  ;;  %v4400_v9 = vld [vmem:[%s5104_s21 + $0x3a0] ss:$8 sps:$4 sm:$0xff]   ;;  %v4405_v10 = vld [vmem:[%s5104_s21 + $0x294] ss:$8 sps:$4 sm:$0xff]  }
  0x92   : > { %2939 = vmatprep.subr.bf16.mxu1 %v4324_v11  ;;  %v4408_v11 = vld [vmem:[%s5104_s21 + $0x394] ss:$8 sps:$4 sm:$0xff]  }
  0x93   : > { %2843 = vmatmul.mubr.bf16.vlgmr.msra.gmra.mxu0 %v3732_v12  ;;  %v4403_v12 = vld [vmem:[%s5104_s21 + $0x290] ss:$8 sps:$4 sm:$0xff]  }
  0x94   : > { %2886 = vmatmul.mubr.bf16.vlgmr.msra.gmra.mxu1 %v3734_v13  ;;  %2897 = vmatpush1.bf16.msra.mxu0 %v4319_v14  ;;  %v4406_v13 = vld [vmem:[%s5104_s21 + $0x390] ss:$8 sps:$4 sm:$0xff]   ;;  %v4411_v14 = vld [vmem:[%s5104_s21 + $0x284] ss:$8 sps:$4 sm:$0xff]  }
  0x95   : > { %2940 = vmatpush1.bf16.msra.mxu1 %v4322_v15  ;;  %2898 = vmatprep.subr.bf16.mxu0 %v4327_v16  ;;  %v4414_v15 = vld [vmem:[%s5104_s21 + $0x384] ss:$8 sps:$4 sm:$0xff]   ;;  %v4409_v16 = vld [vmem:[%s5104_s21 + $0x280] ss:$8 sps:$4 sm:$0xff]  }
  0x96   : > { %2941 = vmatprep.subr.bf16.mxu1 %v4330_v17  ;;  %2928 = vmatprep.mubr.bf16.mxu0 %v3737_v45  ;;  %v4412_v17 = vld [vmem:[%s5104_s21 + $0x380] ss:$8 sps:$4 sm:$0xff]   ;;  %v4442_v45 = vld [vmem:[%s5104_s21 + $0x530] ss:$8 sps:$4 sm:$0xff]  }
  0x97   : > { %2971 = vmatprep.mubr.bf16.mxu1 %v3739_v47  ;;  %v4450_v47 = vld [vmem:[%s5104_s21 + $0x524] ss:$8 sps:$4 sm:$0xff]  }
  0x98   : > { %2899 = vmatpush1.bf16.msra.mxu0 %v4325_v18  ;;  %v4417_v18 = vld [vmem:[%s5104_s21 + $0x474] ss:$8 sps:$4 sm:$0xff]  }
  0x99   : > { %2942 = vmatpush1.bf16.msra.mxu1 %v4328_v19  ;;  %2900 = vmatprep.subr.bf16.mxu0 %v4333_v20  ;;  %v4420_v19 = vld [vmem:[%s5104_s21 + $0x574] ss:$8 sps:$4 sm:$0xff]   ;;  %v3736_v20 = vcombine.low %v5225_v40, %v5230_v41  ;;  %v4433_v40 = vld [vmem:[%s5104_s21 + $0x440] ss:$8 sps:$4 sm:$0xff]  }
  0x9a   : > { %2943 = vmatprep.subr.bf16.mxu1 %v4336_v21  ;;  %v3738_v21 = vcombine.low %v5235_v42, %v5240_v43  ;;  %v4436_v41 = vld [vmem:[%s5104_s21 + $0x540] ss:$8 sps:$4 sm:$0xff]   ;;  %v4441_v42 = vld [vmem:[%s5104_s21 + $0x434] ss:$8 sps:$4 sm:$0xff]  }
  0x9b   : > { %v4444_v43 = vld [vmem:[%s5104_s21 + $0x534] ss:$8 sps:$4 sm:$0xff]  }
  0x9c   : > { %2901 = vmatpush1.bf16.msra.mxu0 %v4331_v22  ;;  %v4415_v22 = vld [vmem:[%s5104_s21 + $0x470] ss:$8 sps:$4 sm:$0xff]  }
  0x9d   : > { %2944 = vmatpush1.bf16.msra.mxu1 %v4334_v23  ;;  %2902 = vmatprep.subr.bf16.mxu0 %v4339_v24  ;;  %v4418_v23 = vld [vmem:[%s5104_s21 + $0x570] ss:$8 sps:$4 sm:$0xff]   ;;  %v4423_v24 = vld [vmem:[%s5104_s21 + $0x464] ss:$8 sps:$4 sm:$0xff]  }
  0x9e   : > { %2945 = vmatprep.subr.bf16.mxu1 %v4342_v25  ;;  %v4426_v25 = vld [vmem:[%s5104_s21 + $0x564] ss:$8 sps:$4 sm:$0xff]  }
  0xa0   : > { %2903 = vmatpush1.bf16.msra.mxu0 %v4337_v26  ;;  %v4421_v26 = vld [vmem:[%s5104_s21 + $0x460] ss:$8 sps:$4 sm:$0xff]  }
  0xa1   : > { %2946 = vmatpush1.bf16.msra.mxu1 %v4340_v27  ;;  %2904 = vmatprep.subr.bf16.mxu0 %v4345_v28  ;;  %v4424_v27 = vld [vmem:[%s5104_s21 + $0x560] ss:$8 sps:$4 sm:$0xff]  }
  0xa2   : > { %2947 = vmatprep.subr.bf16.mxu1 %v4348_v29  ;;  %v5297_v28 = vld [vmem:[%s5720_s0 + $0x20] sm:$0xff] }
  0xa3   : > { %v5302_v29 = vld [vmem:[%s5720_s0 + $0x80] sm:$0xff] }
  0xa4   : > { %2905 = vmatpush1.bf16.msra.mxu0 %v4343_v30  ;;  %v5307_v30 = vld [vmem:[%s5720_s0 + $0x28] sm:$0xff] }
  0xa5   : > { %2948 = vmatpush1.bf16.msra.mxu1 %v4346_v31  ;;  %2906 = vmatprep.subr.bf16.mxu0 %v4351_v32  ;;  %v5312_v31 = vld [vmem:[%s5720_s0 + $0x88] sm:$0xff]  ;;  %v4429_v32 = vld [vmem:[%s5104_s21 + $0x454] ss:$8 sps:$4 sm:$0xff]  }
  0xa6   : > { %2949 = vmatprep.subr.bf16.mxu1 %v4354_v33  ;;  %v3741_v33 = vcombine.high %v5297_v28, %v5302_v29 }
  0xa8   : > { %2907 = vmatpush1.bf16.msra.mxu0 %v4349_v34  ;;  %v4432_v34 = vld [vmem:[%s5104_s21 + $0x554] ss:$8 sps:$4 sm:$0xff]  }
  0xa9   : > { %2950 = vmatpush1.bf16.msra.mxu1 %v4352_v35  ;;  %2908 = vmatprep.subr.bf16.mxu0 %v4357_v36  ;;  %v3743_v35 = vcombine.high %v5307_v30, %v5312_v31  ;;  %v4427_v36 = vld [vmem:[%s5104_s21 + $0x450] ss:$8 sps:$4 sm:$0xff]  }
  0xaa   : > { %2951 = vmatprep.subr.bf16.mxu1 %v4360_v37  ;;  %v4430_v37 = vld [vmem:[%s5104_s21 + $0x550] ss:$8 sps:$4 sm:$0xff]  }
  0xac   : > { %2909 = vmatpush1.bf16.msra.mxu0 %v4355_v38  ;;  %v4435_v38 = vld [vmem:[%s5104_s21 + $0x444] ss:$8 sps:$4 sm:$0xff]  }
  0xad   : > { %2952 = vmatpush1.bf16.msra.mxu1 %v4358_v39  ;;  %2910 = vmatprep.subr.bf16.mxu0 %v4363_v44  ;;  %v4438_v39 = vld [vmem:[%s5104_s21 + $0x544] ss:$8 sps:$4 sm:$0xff]   ;;  %v4439_v44 = vld [vmem:[%s5104_s21 + $0x430] ss:$8 sps:$4 sm:$0xff]  }
  0xae   : > { %2953 = vmatprep.subr.bf16.mxu1 %v4366_v46  ;;  %v4447_v46 = vld [vmem:[%s5104_s21 + $0x424] ss:$8 sps:$4 sm:$0xff]  }
  0xb0   : > { %2911 = vmatpush1.bf16.msra.mxu0 %v4361_v48  ;;  %v4445_v48 = vld [vmem:[%s5104_s21 + $0x420] ss:$8 sps:$4 sm:$0xff]  }
  0xb1   : > { %2954 = vmatpush1.bf16.msra.mxu1 %v4364_v49  ;;  %2912 = vmatprep.subr.bf16.mxu0 %v4369_v50  ;;  %v4448_v49 = vld [vmem:[%s5104_s21 + $0x520] ss:$8 sps:$4 sm:$0xff]   ;;  %v4453_v50 = vld [vmem:[%s5104_s21 + $0x414] ss:$8 sps:$4 sm:$0xff]  }
  0xb2   : > { %2955 = vmatprep.subr.bf16.mxu1 %v4372_v51  ;;  %v4456_v51 = vld [vmem:[%s5104_s21 + $0x514] ss:$8 sps:$4 sm:$0xff]  }
  0xb4   : > { %2913 = vmatpush2.bf16.msra.mxu0 %v4367_v52  ;;  %v4451_v52 = vld [vmem:[%s5104_s21 + $0x410] ss:$8 sps:$4 sm:$0xff]  }
  0xb5   : > { %2956 = vmatpush2.bf16.msra.mxu1 %v4370_v53  ;;  %2914 = vmatprep.subr.bf16.mxu0 %v4375_v54  ;;  %v4454_v53 = vld [vmem:[%s5104_s21 + $0x510] ss:$8 sps:$4 sm:$0xff]   ;;  %v4459_v54 = vld [vmem:[%s5104_s21 + $0x404] ss:$8 sps:$4 sm:$0xff]  }
  0xb6   : > { %2957 = vmatprep.subr.bf16.mxu1 %v4378_v55  ;;  %v4462_v55 = vld [vmem:[%s5104_s21 + $0x504] ss:$8 sps:$4 sm:$0xff]  }
  0xb8   : > { %2915 = vmatpush2.bf16.msra.mxu0 %v4373_v56  ;;  %v4457_v56 = vld [vmem:[%s5104_s21 + $0x400] ss:$8 sps:$4 sm:$0xff]  }
  0xb9   : > { %2958 = vmatpush2.bf16.msra.mxu1 %v4376_v57  ;;  %2916 = vmatprep.subr.bf16.mxu0 %v4381_v58  ;;  %v4460_v57 = vld [vmem:[%s5104_s21 + $0x500] ss:$8 sps:$4 sm:$0xff]   ;;  %v4465_v58 = vld [vmem:[%s5104_s21 + $0x4f4] ss:$8 sps:$4 sm:$0xff]  }
  0xba   : > { %2959 = vmatprep.subr.bf16.mxu1 %v4384_v59  ;;  %v4468_v59 = vld [vmem:[%s5104_s21 + $0x5f4] ss:$8 sps:$4 sm:$0xff]  }
  0xbc   : > { %2917 = vmatpush2.bf16.msra.mxu0 %v4379_v60  ;;  %v4463_v60 = vld [vmem:[%s5104_s21 + $0x4f0] ss:$8 sps:$4 sm:$0xff]  }
  0xbd   : > { %2960 = vmatpush2.bf16.msra.mxu1 %v4382_v61  ;;  %2918 = vmatprep.subr.bf16.mxu0 %v4387_v62  ;;  %v4466_v61 = vld [vmem:[%s5104_s21 + $0x5f0] ss:$8 sps:$4 sm:$0xff]   ;;  %v4471_v62 = vld [vmem:[%s5104_s21 + $0x4e4] ss:$8 sps:$4 sm:$0xff]  }
  0xbe   : > { %2961 = vmatprep.subr.bf16.mxu1 %v4390_v63  ;;  %v4474_v63 = vld [vmem:[%s5104_s21 + $0x5e4] ss:$8 sps:$4 sm:$0xff]  }
  0xc0   : > { %2919 = vmatpush2.bf16.msra.mxu0 %v4385_v0  ;;  %v4469_v0 = vld [vmem:[%s5104_s21 + $0x4e0] ss:$8 sps:$4 sm:$0xff]  }
  0xc1   : > { %2962 = vmatpush2.bf16.msra.mxu1 %v4388_v1  ;;  %2920 = vmatprep.subr.bf16.mxu0 %v4393_v2  ;;  %v4472_v1 = vld [vmem:[%s5104_s21 + $0x5e0] ss:$8 sps:$4 sm:$0xff]   ;;  %v4477_v2 = vld [vmem:[%s5104_s21 + $0x4d4] ss:$8 sps:$4 sm:$0xff]  }
  0xc2   : > { %2963 = vmatprep.subr.bf16.mxu1 %v4396_v3  ;;  %v4480_v3 = vld [vmem:[%s5104_s21 + $0x5d4] ss:$8 sps:$4 sm:$0xff]  }
  0xc4   : > { %2921 = vmatpush2.bf16.msra.mxu0 %v4391_v4  ;;  %v4475_v4 = vld [vmem:[%s5104_s21 + $0x4d0] ss:$8 sps:$4 sm:$0xff]  }
  0xc5   : > { %2964 = vmatpush2.bf16.msra.mxu1 %v4394_v5  ;;  %2922 = vmatprep.subr.bf16.mxu0 %v4399_v6  ;;  %v4478_v5 = vld [vmem:[%s5104_s21 + $0x5d0] ss:$8 sps:$4 sm:$0xff]   ;;  %v4483_v6 = vld [vmem:[%s5104_s21 + $0x4c4] ss:$8 sps:$4 sm:$0xff]  }
  0xc6   : > { %2965 = vmatprep.subr.bf16.mxu1 %v4402_v7  ;;  %v4486_v7 = vld [vmem:[%s5104_s21 + $0x5c4] ss:$8 sps:$4 sm:$0xff]  }
  0xc8   : > { %2923 = vmatpush2.bf16.msra.mxu0 %v4397_v8  ;;  %v4481_v8 = vld [vmem:[%s5104_s21 + $0x4c0] ss:$8 sps:$4 sm:$0xff]  }
  0xc9   : > { %2966 = vmatpush2.bf16.msra.mxu1 %v4400_v9  ;;  %2924 = vmatprep.subr.bf16.mxu0 %v4405_v10  ;;  %v4484_v9 = vld [vmem:[%s5104_s21 + $0x5c0] ss:$8 sps:$4 sm:$0xff]   ;;  %v4489_v10 = vld [vmem:[%s5104_s21 + $0x4b4] ss:$8 sps:$4 sm:$0xff]  }
  0xca   : > { %2967 = vmatprep.subr.bf16.mxu1 %v4408_v11  ;;  %v4492_v11 = vld [vmem:[%s5104_s21 + $0x5b4] ss:$8 sps:$4 sm:$0xff]  }
  0xcc   : > { %2925 = vmatpush2.bf16.msra.mxu0 %v4403_v12  ;;  %v4487_v12 = vld [vmem:[%s5104_s21 + $0x4b0] ss:$8 sps:$4 sm:$0xff]  }
  0xcd   : > { %2968 = vmatpush2.bf16.msra.mxu1 %v4406_v13  ;;  %2926 = vmatprep.subr.bf16.mxu0 %v4411_v14  ;;  %v4490_v13 = vld [vmem:[%s5104_s21 + $0x5b0] ss:$8 sps:$4 sm:$0xff]   ;;  %v4495_v14 = vld [vmem:[%s5104_s21 + $0x4a4] ss:$8 sps:$4 sm:$0xff]  }
  0xce   : > { %2969 = vmatprep.subr.bf16.mxu1 %v4414_v15  ;;  %v4498_v15 = vld [vmem:[%s5104_s21 + $0x5a4] ss:$8 sps:$4 sm:$0xff]  }
  0xd0   : > { %2927 = vmatpush2.bf16.msra.mxu0 %v4409_v16  ;;  %v4493_v16 = vld [vmem:[%s5104_s21 + $0x4a0] ss:$8 sps:$4 sm:$0xff]  }
  0xd1   : > { %2970 = vmatpush2.bf16.msra.mxu1 %v4412_v17  ;;  %2982 = vmatprep.subr.bf16.mxu0 %v4417_v18  ;;  %v4496_v17 = vld [vmem:[%s5104_s21 + $0x5a0] ss:$8 sps:$4 sm:$0xff]   ;;  %v4501_v18 = vld [vmem:[%s5104_s21 + $0x494] ss:$8 sps:$4 sm:$0xff]  }
  0xd2   : > { %3025 = vmatprep.subr.bf16.mxu1 %v4420_v19  ;;  %v4504_v19 = vld [vmem:[%s5104_s21 + $0x594] ss:$8 sps:$4 sm:$0xff]  }
  0xd3   : > { %2929 = vmatmul.mubr.bf16.vlgmr.msra.gmra.mxu0 %v3736_v20  ;;  %v4499_v20 = vld [vmem:[%s5104_s21 + $0x490] ss:$8 sps:$4 sm:$0xff]  }
  0xd4   : > { %2972 = vmatmul.mubr.bf16.vlgmr.msra.gmra.mxu1 %v3738_v21  ;;  %2983 = vmatpush1.bf16.msra.mxu0 %v4415_v22  ;;  %v4502_v21 = vld [vmem:[%s5104_s21 + $0x590] ss:$8 sps:$4 sm:$0xff]   ;;  %v4507_v22 = vld [vmem:[%s5104_s21 + $0x484] ss:$8 sps:$4 sm:$0xff]  }
  0xd5   : > { %3026 = vmatpush1.bf16.msra.mxu1 %v4418_v23  ;;  %2984 = vmatprep.subr.bf16.mxu0 %v4423_v24  ;;  %v4510_v23 = vld [vmem:[%s5104_s21 + $0x584] ss:$8 sps:$4 sm:$0xff]   ;;  %v4505_v24 = vld [vmem:[%s5104_s21 + $0x480] ss:$8 sps:$4 sm:$0xff]  }
  0xd6   : > { %3027 = vmatprep.subr.bf16.mxu1 %v4426_v25  ;;  %3014 = vmatprep.mubr.bf16.mxu0 %v3741_v33  ;;  %v4508_v25 = vld [vmem:[%s5104_s21 + $0x580] ss:$8 sps:$4 sm:$0xff]   ;;  %v4514_v33 = vld [vmem:[%s5104_s21 + $0x770] ss:$8 sps:$4 sm:$0xff]  }
  0xd7   : > { %3057 = vmatprep.mubr.bf16.mxu1 %v3743_v35  ;;  %v5386_v35 = vld [vmem:[%s5720_s0 + $0x90] sm:$0xff] }
  0xd8   : > { %2985 = vmatpush1.bf16.msra.mxu0 %v4421_v26  ;;  %v4513_v26 = vld [vmem:[%s5104_s21 + $0x674] ss:$8 sps:$4 sm:$0xff]  }
  0xd9   : > { %3028 = vmatpush1.bf16.msra.mxu1 %v4424_v27  ;;  %2986 = vmatprep.subr.bf16.mxu0 %v4429_v32  ;;  %v4516_v27 = vld [vmem:[%s5104_s21 + $0x774] ss:$8 sps:$4 sm:$0xff]   ;;  %v4511_v32 = vld [vmem:[%s5104_s21 + $0x670] ss:$8 sps:$4 sm:$0xff]  }
  0xda   : > { %3029 = vmatprep.subr.bf16.mxu1 %v4432_v34  ;;  %v5381_v34 = vld [vmem:[%s5720_s0 + $0x30] sm:$0xff] }
  0xdc   : > { %2987 = vmatpush1.bf16.msra.mxu0 %v4427_v36  ;;  %v3740_v36 = vcombine.low %v5297_v28, %v5302_v29  ;;  %v4522_v28 = vld [vmem:[%s5104_s21 + $0x764] ss:$8 sps:$4 sm:$0xff]   ;;  %v3745_v29 = vcombine.high %v5381_v34, %v5386_v35 }
  0xdd   : > { %3030 = vmatpush1.bf16.msra.mxu1 %v4430_v37  ;;  %2988 = vmatprep.subr.bf16.mxu0 %v4435_v38  ;;  %v3742_v37 = vcombine.low %v5307_v30, %v5312_v31  ;;  %v5395_v38 = vld [vmem:[%s5720_s0 + $0x38] sm:$0xff]  ;;  %v4517_v31 = vld [vmem:[%s5104_s21 + $0x660] ss:$8 sps:$4 sm:$0xff]  }
  0xde   : > { %3031 = vmatprep.subr.bf16.mxu1 %v4438_v39  ;;  %v5400_v39 = vld [vmem:[%s5720_s0 + $0x98] sm:$0xff] }
  0xdf   : > { %v3747_v30 = vcombine.high %v5395_v38, %v5400_v39 }
  0xe0   : > { %2989 = vmatpush1.bf16.msra.mxu0 %v4433_v40  ;;  %v4519_v40 = vld [vmem:[%s5104_s21 + $0x664] ss:$8 sps:$4 sm:$0xff]  }
  0xe1   : > { %3032 = vmatpush1.bf16.msra.mxu1 %v4436_v41  ;;  %2990 = vmatprep.subr.bf16.mxu0 %v4441_v42  ;;  %v4520_v41 = vld [vmem:[%s5104_s21 + $0x760] ss:$8 sps:$4 sm:$0xff]   ;;  %v4525_v42 = vld [vmem:[%s5104_s21 + $0x654] ss:$8 sps:$4 sm:$0xff]  }
  0xe2   : > { %3033 = vmatprep.subr.bf16.mxu1 %v4444_v43  ;;  %v4528_v43 = vld [vmem:[%s5104_s21 + $0x754] ss:$8 sps:$4 sm:$0xff]  }
  0xe4   : > { %2991 = vmatpush1.bf16.msra.mxu0 %v4439_v44  ;;  %v4523_v44 = vld [vmem:[%s5104_s21 + $0x650] ss:$8 sps:$4 sm:$0xff]  }
  0xe5   : > { %3034 = vmatpush1.bf16.msra.mxu1 %v4442_v45  ;;  %2992 = vmatprep.subr.bf16.mxu0 %v4447_v46  ;;  %v4526_v45 = vld [vmem:[%s5104_s21 + $0x750] ss:$8 sps:$4 sm:$0xff]   ;;  %v4531_v46 = vld [vmem:[%s5104_s21 + $0x644] ss:$8 sps:$4 sm:$0xff]  }
  0xe6   : > { %3035 = vmatprep.subr.bf16.mxu1 %v4450_v47  ;;  %v4534_v47 = vld [vmem:[%s5104_s21 + $0x744] ss:$8 sps:$4 sm:$0xff]  }
  0xe8   : > { %2993 = vmatpush1.bf16.msra.mxu0 %v4445_v48  ;;  %v4529_v48 = vld [vmem:[%s5104_s21 + $0x640] ss:$8 sps:$4 sm:$0xff]  }
  0xe9   : > { %3036 = vmatpush1.bf16.msra.mxu1 %v4448_v49  ;;  %2994 = vmatprep.subr.bf16.mxu0 %v4453_v50  ;;  %v4532_v49 = vld [vmem:[%s5104_s21 + $0x740] ss:$8 sps:$4 sm:$0xff]   ;;  %v4537_v50 = vld [vmem:[%s5104_s21 + $0x634] ss:$8 sps:$4 sm:$0xff]  }
  0xea   : > { %3037 = vmatprep.subr.bf16.mxu1 %v4456_v51  ;;  %v4540_v51 = vld [vmem:[%s5104_s21 + $0x734] ss:$8 sps:$4 sm:$0xff]  }
  0xec   : > { %2995 = vmatpush1.bf16.msra.mxu0 %v4451_v52  ;;  %v4535_v52 = vld [vmem:[%s5104_s21 + $0x630] ss:$8 sps:$4 sm:$0xff]  }
  0xed   : > { %3038 = vmatpush1.bf16.msra.mxu1 %v4454_v53  ;;  %2996 = vmatprep.subr.bf16.mxu0 %v4459_v54  ;;  %v4538_v53 = vld [vmem:[%s5104_s21 + $0x730] ss:$8 sps:$4 sm:$0xff]   ;;  %v4543_v54 = vld [vmem:[%s5104_s21 + $0x624] ss:$8 sps:$4 sm:$0xff]  }
  0xee   : > { %3039 = vmatprep.subr.bf16.mxu1 %v4462_v55  ;;  %v4546_v55 = vld [vmem:[%s5104_s21 + $0x724] ss:$8 sps:$4 sm:$0xff]  }
  0xf0   : > { %2997 = vmatpush1.bf16.msra.mxu0 %v4457_v56  ;;  %v4541_v56 = vld [vmem:[%s5104_s21 + $0x620] ss:$8 sps:$4 sm:$0xff]  }
  0xf1   : > { %3040 = vmatpush1.bf16.msra.mxu1 %v4460_v57  ;;  %2998 = vmatprep.subr.bf16.mxu0 %v4465_v58  ;;  %v4544_v57 = vld [vmem:[%s5104_s21 + $0x720] ss:$8 sps:$4 sm:$0xff]   ;;  %v4549_v58 = vld [vmem:[%s5104_s21 + $0x614] ss:$8 sps:$4 sm:$0xff]  }
  0xf2   : > { %3041 = vmatprep.subr.bf16.mxu1 %v4468_v59  ;;  %v4552_v59 = vld [vmem:[%s5104_s21 + $0x714] ss:$8 sps:$4 sm:$0xff]  }
  0xf4   : > { %2999 = vmatpush2.bf16.msra.mxu0 %v4463_v60  ;;  %v4547_v60 = vld [vmem:[%s5104_s21 + $0x610] ss:$8 sps:$4 sm:$0xff]  }
  0xf5   : > { %3042 = vmatpush2.bf16.msra.mxu1 %v4466_v61  ;;  %3000 = vmatprep.subr.bf16.mxu0 %v4471_v62  ;;  %v4550_v61 = vld [vmem:[%s5104_s21 + $0x710] ss:$8 sps:$4 sm:$0xff]   ;;  %v4555_v62 = vld [vmem:[%s5104_s21 + $0x604] ss:$8 sps:$4 sm:$0xff]  }
  0xf6   : > { %3043 = vmatprep.subr.bf16.mxu1 %v4474_v63  ;;  %v4558_v63 = vld [vmem:[%s5104_s21 + $0x704] ss:$8 sps:$4 sm:$0xff]  }
  0xf8   : > { %3001 = vmatpush2.bf16.msra.mxu0 %v4469_v0  ;;  %v4553_v0 = vld [vmem:[%s5104_s21 + $0x600] ss:$8 sps:$4 sm:$0xff]  }
  0xf9   : > { %3044 = vmatpush2.bf16.msra.mxu1 %v4472_v1  ;;  %3002 = vmatprep.subr.bf16.mxu0 %v4477_v2  ;;  %v4556_v1 = vld [vmem:[%s5104_s21 + $0x700] ss:$8 sps:$4 sm:$0xff]   ;;  %v4561_v2 = vld [vmem:[%s5104_s21 + $0x6f4] ss:$8 sps:$4 sm:$0xff]  }
  0xfa   : > { %3045 = vmatprep.subr.bf16.mxu1 %v4480_v3  ;;  %v4564_v3 = vld [vmem:[%s5104_s21 + $0x7f4] ss:$8 sps:$4 sm:$0xff]  }
  0xfc   : > { %3003 = vmatpush2.bf16.msra.mxu0 %v4475_v4  ;;  %v4559_v4 = vld [vmem:[%s5104_s21 + $0x6f0] ss:$8 sps:$4 sm:$0xff]  }
  0xfd   : > { %3046 = vmatpush2.bf16.msra.mxu1 %v4478_v5  ;;  %3004 = vmatprep.subr.bf16.mxu0 %v4483_v6  ;;  %v4562_v5 = vld [vmem:[%s5104_s21 + $0x7f0] ss:$8 sps:$4 sm:$0xff]   ;;  %v4567_v6 = vld [vmem:[%s5104_s21 + $0x6e4] ss:$8 sps:$4 sm:$0xff]  }
  0xfe   : > { %3047 = vmatprep.subr.bf16.mxu1 %v4486_v7  ;;  %v4570_v7 = vld [vmem:[%s5104_s21 + $0x7e4] ss:$8 sps:$4 sm:$0xff]  }
 0x100   : > { %3005 = vmatpush2.bf16.msra.mxu0 %v4481_v8  ;;  %v4565_v8 = vld [vmem:[%s5104_s21 + $0x6e0] ss:$8 sps:$4 sm:$0xff]  }
 0x101   : > { %3048 = vmatpush2.bf16.msra.mxu1 %v4484_v9  ;;  %3006 = vmatprep.subr.bf16.mxu0 %v4489_v10  ;;  %v4568_v9 = vld [vmem:[%s5104_s21 + $0x7e0] ss:$8 sps:$4 sm:$0xff]   ;;  %v4573_v10 = vld [vmem:[%s5104_s21 + $0x6d4] ss:$8 sps:$4 sm:$0xff]  }
 0x102   : > { %3049 = vmatprep.subr.bf16.mxu1 %v4492_v11  ;;  %v4576_v11 = vld [vmem:[%s5104_s21 + $0x7d4] ss:$8 sps:$4 sm:$0xff]  }
 0x104   : > { %3007 = vmatpush2.bf16.msra.mxu0 %v4487_v12  ;;  %v4571_v12 = vld [vmem:[%s5104_s21 + $0x6d0] ss:$8 sps:$4 sm:$0xff]  }
 0x105   : > { %3050 = vmatpush2.bf16.msra.mxu1 %v4490_v13  ;;  %3008 = vmatprep.subr.bf16.mxu0 %v4495_v14  ;;  %v4574_v13 = vld [vmem:[%s5104_s21 + $0x7d0] ss:$8 sps:$4 sm:$0xff]   ;;  %v4579_v14 = vld [vmem:[%s5104_s21 + $0x6c4] ss:$8 sps:$4 sm:$0xff]  }
 0x106   : > { %3051 = vmatprep.subr.bf16.mxu1 %v4498_v15  ;;  %v4582_v15 = vld [vmem:[%s5104_s21 + $0x7c4] ss:$8 sps:$4 sm:$0xff]  }
 0x108   : > { %3009 = vmatpush2.bf16.msra.mxu0 %v4493_v16  ;;  %v4577_v16 = vld [vmem:[%s5104_s21 + $0x6c0] ss:$8 sps:$4 sm:$0xff]  }
 0x109   : > { %3052 = vmatpush2.bf16.msra.mxu1 %v4496_v17  ;;  %3010 = vmatprep.subr.bf16.mxu0 %v4501_v18  ;;  %v4580_v17 = vld [vmem:[%s5104_s21 + $0x7c0] ss:$8 sps:$4 sm:$0xff]   ;;  %v4585_v18 = vld [vmem:[%s5104_s21 + $0x6b4] ss:$8 sps:$4 sm:$0xff]  }
 0x10a   : > { %3053 = vmatprep.subr.bf16.mxu1 %v4504_v19  ;;  %v4588_v19 = vld [vmem:[%s5104_s21 + $0x7b4] ss:$8 sps:$4 sm:$0xff]  }
 0x10c   : > { %3011 = vmatpush2.bf16.msra.mxu0 %v4499_v20  ;;  %v4583_v20 = vld [vmem:[%s5104_s21 + $0x6b0] ss:$8 sps:$4 sm:$0xff]  }
 0x10d   : > { %3054 = vmatpush2.bf16.msra.mxu1 %v4502_v21  ;;  %3012 = vmatprep.subr.bf16.mxu0 %v4507_v22  ;;  %v4586_v21 = vld [vmem:[%s5104_s21 + $0x7b0] ss:$8 sps:$4 sm:$0xff]   ;;  %v4591_v22 = vld [vmem:[%s5104_s21 + $0x6a4] ss:$8 sps:$4 sm:$0xff]  }
 0x10e   : > { %3055 = vmatprep.subr.bf16.mxu1 %v4510_v23  ;;  %v4594_v23 = vld [vmem:[%s5104_s21 + $0x7a4] ss:$8 sps:$4 sm:$0xff]  }
 0x110   : > { %3013 = vmatpush2.bf16.msra.mxu0 %v4505_v24  ;;  %v4589_v24 = vld [vmem:[%s5104_s21 + $0x6a0] ss:$8 sps:$4 sm:$0xff]  }
 0x111   : > { %3056 = vmatpush2.bf16.msra.mxu1 %v4508_v25  ;;  %3068 = vmatprep.subr.bf16.mxu0 %v4513_v26  ;;  %v4592_v25 = vld [vmem:[%s5104_s21 + $0x7a0] ss:$8 sps:$4 sm:$0xff]   ;;  %v4597_v26 = vld [vmem:[%s5104_s21 + $0x694] ss:$8 sps:$4 sm:$0xff]  }
 0x112   : > { %3111 = vmatprep.subr.bf16.mxu1 %v4516_v27  ;;  %v4600_v27 = vld [vmem:[%s5104_s21 + $0x794] ss:$8 sps:$4 sm:$0xff]  }
 0x113   : > { %3015 = vmatmul.mubr.bf16.vlgmr.msra.gmra.mxu0 %v3740_v36  ;;  %v4603_v36 = vld [vmem:[%s5104_s21 + $0x684] ss:$8 sps:$4 sm:$0xff]  }
 0x114   : > { %3058 = vmatmul.mubr.bf16.vlgmr.msra.gmra.mxu1 %v3742_v37  ;;  %3069 = vmatpush1.bf16.msra.mxu0 %v4511_v32  ;;  %v4595_v32 = vld [vmem:[%s5104_s21 + $0x690] ss:$8 sps:$4 sm:$0xff]   ;;  %v4606_v37 = vld [vmem:[%s5104_s21 + $0x784] ss:$8 sps:$4 sm:$0xff]  }
 0x115   : > { %3112 = vmatpush1.bf16.msra.mxu1 %v4514_v33  ;;  %3070 = vmatprep.subr.bf16.mxu0 %v4519_v40  ;;  %v4598_v33 = vld [vmem:[%s5104_s21 + $0x790] ss:$8 sps:$4 sm:$0xff]   ;;  %v4601_v40 = vld [vmem:[%s5104_s21 + $0x680] ss:$8 sps:$4 sm:$0xff]  }
 0x116   : > { %3113 = vmatprep.subr.bf16.mxu1 %v4522_v28  ;;  %3100 = vmatprep.mubr.bf16.mxu0 %v3745_v29  ;;  %v4604_v28 = vld [vmem:[%s5104_s21 + $0x780] ss:$8 sps:$4 sm:$0xff]   ;;  %v4609_v29 = vld [vmem:[%s5104_s21 + $0x874] ss:$8 sps:$4 sm:$0xff]  }
 0x117   : > { %3143 = vmatprep.mubr.bf16.mxu1 %v3747_v30  ;;  %v4612_v30 = vld [vmem:[%s5104_s21 + $0x974] ss:$8 sps:$4 sm:$0xff]  }
 0x118   : > { %3071 = vmatpush1.bf16.msra.mxu0 %v4517_v31  ;;  %v4607_v31 = vld [vmem:[%s5104_s21 + $0x870] ss:$8 sps:$4 sm:$0xff]  }
 0x119   : > { %3114 = vmatpush1.bf16.msra.mxu1 %v4520_v41  ;;  %3072 = vmatprep.subr.bf16.mxu0 %v4525_v42  ;;  %v4610_v41 = vld [vmem:[%s5104_s21 + $0x970] ss:$8 sps:$4 sm:$0xff]   ;;  %v5473_v42 = vld [vmem:[%s5720_s0 + $0x40] sm:$0xff] }
 0x11a   : > { %3115 = vmatprep.subr.bf16.mxu1 %v4528_v43  ;;  %v5478_v43 = vld [vmem:[%s5720_s0 + $0xa0] sm:$0xff] }
 0x11c   : > { %3073 = vmatpush1.bf16.msra.mxu0 %v4523_v44  ;;  %v3744_v44 = vcombine.low %v5381_v34, %v5386_v35  ;;  %v4618_v34 = vld [vmem:[%s5104_s21 + $0x964] ss:$8 sps:$4 sm:$0xff]   ;;  %v3749_v35 = vcombine.high %v5473_v42, %v5478_v43 }
 0x11d   : > { %3116 = vmatpush1.bf16.msra.mxu1 %v4526_v45  ;;  %3074 = vmatprep.subr.bf16.mxu0 %v4531_v46  ;;  %v3746_v45 = vcombine.low %v5395_v38, %v5400_v39  ;;  %v5487_v46 = vld [vmem:[%s5720_s0 + $0x48] sm:$0xff] }
 0x11e   : > { %3117 = vmatprep.subr.bf16.mxu1 %v4534_v47  ;;  %v5492_v47 = vld [vmem:[%s5720_s0 + $0xa8] sm:$0xff] }
 0x11f   : > { %v3751_v38 = vcombine.high %v5487_v46, %v5492_v47  ;;  %v4613_v39 = vld [vmem:[%s5104_s21 + $0x860] ss:$8 sps:$4 sm:$0xff]  }
 0x120   : > { %3075 = vmatpush1.bf16.msra.mxu0 %v4529_v48  ;;  %v4615_v48 = vld [vmem:[%s5104_s21 + $0x864] ss:$8 sps:$4 sm:$0xff]  }
 0x121   : > { %3118 = vmatpush1.bf16.msra.mxu1 %v4532_v49  ;;  %3076 = vmatprep.subr.bf16.mxu0 %v4537_v50  ;;  %v4616_v49 = vld [vmem:[%s5104_s21 + $0x960] ss:$8 sps:$4 sm:$0xff]   ;;  %v4621_v50 = vld [vmem:[%s5104_s21 + $0x854] ss:$8 sps:$4 sm:$0xff]  }
 0x122   : > { %3119 = vmatprep.subr.bf16.mxu1 %v4540_v51  ;;  %v4624_v51 = vld [vmem:[%s5104_s21 + $0x954] ss:$8 sps:$4 sm:$0xff]  }
 0x124   : > { %3077 = vmatpush1.bf16.msra.mxu0 %v4535_v52  ;;  %v4619_v52 = vld [vmem:[%s5104_s21 + $0x850] ss:$8 sps:$4 sm:$0xff]  }
 0x125   : > { %3120 = vmatpush1.bf16.msra.mxu1 %v4538_v53  ;;  %3078 = vmatprep.subr.bf16.mxu0 %v4543_v54  ;;  %v4622_v53 = vld [vmem:[%s5104_s21 + $0x950] ss:$8 sps:$4 sm:$0xff]   ;;  %v4627_v54 = vld [vmem:[%s5104_s21 + $0x844] ss:$8 sps:$4 sm:$0xff]  }
 0x126   : > { %3121 = vmatprep.subr.bf16.mxu1 %v4546_v55  ;;  %v4630_v55 = vld [vmem:[%s5104_s21 + $0x944] ss:$8 sps:$4 sm:$0xff]  }
 0x128   : > { %3079 = vmatpush1.bf16.msra.mxu0 %v4541_v56  ;;  %v4625_v56 = vld [vmem:[%s5104_s21 + $0x840] ss:$8 sps:$4 sm:$0xff]  }
 0x129   : > { %3122 = vmatpush1.bf16.msra.mxu1 %v4544_v57  ;;  %3080 = vmatprep.subr.bf16.mxu0 %v4549_v58  ;;  %v4628_v57 = vld [vmem:[%s5104_s21 + $0x940] ss:$8 sps:$4 sm:$0xff]   ;;  %v4633_v58 = vld [vmem:[%s5104_s21 + $0x834] ss:$8 sps:$4 sm:$0xff]  }
 0x12a   : > { %3123 = vmatprep.subr.bf16.mxu1 %v4552_v59  ;;  %v4636_v59 = vld [vmem:[%s5104_s21 + $0x934] ss:$8 sps:$4 sm:$0xff]  }
 0x12c   : > { %3081 = vmatpush1.bf16.msra.mxu0 %v4547_v60  ;;  %v4631_v60 = vld [vmem:[%s5104_s21 + $0x830] ss:$8 sps:$4 sm:$0xff]  }
 0x12d   : > { %3124 = vmatpush1.bf16.msra.mxu1 %v4550_v61  ;;  %3082 = vmatprep.subr.bf16.mxu0 %v4555_v62  ;;  %v4634_v61 = vld [vmem:[%s5104_s21 + $0x930] ss:$8 sps:$4 sm:$0xff]   ;;  %v4639_v62 = vld [vmem:[%s5104_s21 + $0x824] ss:$8 sps:$4 sm:$0xff]  }
 0x12e   : > { %3125 = vmatprep.subr.bf16.mxu1 %v4558_v63  ;;  %v4642_v63 = vld [vmem:[%s5104_s21 + $0x924] ss:$8 sps:$4 sm:$0xff]  }
 0x130   : > { %3083 = vmatpush1.bf16.msra.mxu0 %v4553_v0  ;;  %v4637_v0 = vld [vmem:[%s5104_s21 + $0x820] ss:$8 sps:$4 sm:$0xff]  }
 0x131   : > { %3126 = vmatpush1.bf16.msra.mxu1 %v4556_v1  ;;  %3084 = vmatprep.subr.bf16.mxu0 %v4561_v2  ;;  %v4640_v1 = vld [vmem:[%s5104_s21 + $0x920] ss:$8 sps:$4 sm:$0xff]   ;;  %v4645_v2 = vld [vmem:[%s5104_s21 + $0x814] ss:$8 sps:$4 sm:$0xff]  }
 0x132   : > { %3127 = vmatprep.subr.bf16.mxu1 %v4564_v3  ;;  %v4648_v3 = vld [vmem:[%s5104_s21 + $0x914] ss:$8 sps:$4 sm:$0xff]  }
 0x134   : > { %3085 = vmatpush2.bf16.msra.mxu0 %v4559_v4  ;;  %v4643_v4 = vld [vmem:[%s5104_s21 + $0x810] ss:$8 sps:$4 sm:$0xff]  }
 0x135   : > { %3128 = vmatpush2.bf16.msra.mxu1 %v4562_v5  ;;  %3086 = vmatprep.subr.bf16.mxu0 %v4567_v6  ;;  %v4646_v5 = vld [vmem:[%s5104_s21 + $0x910] ss:$8 sps:$4 sm:$0xff]   ;;  %v4651_v6 = vld [vmem:[%s5104_s21 + $0x804] ss:$8 sps:$4 sm:$0xff]  }
 0x136   : > { %3129 = vmatprep.subr.bf16.mxu1 %v4570_v7  ;;  %v4654_v7 = vld [vmem:[%s5104_s21 + $0x904] ss:$8 sps:$4 sm:$0xff]  }
 0x138   : > { %3087 = vmatpush2.bf16.msra.mxu0 %v4565_v8  ;;  %v4649_v8 = vld [vmem:[%s5104_s21 + $0x800] ss:$8 sps:$4 sm:$0xff]  }
 0x139   : > { %3130 = vmatpush2.bf16.msra.mxu1 %v4568_v9  ;;  %3088 = vmatprep.subr.bf16.mxu0 %v4573_v10  ;;  %v4652_v9 = vld [vmem:[%s5104_s21 + $0x900] ss:$8 sps:$4 sm:$0xff]   ;;  %v4657_v10 = vld [vmem:[%s5104_s21 + $0x8f4] ss:$8 sps:$4 sm:$0xff]  }
 0x13a   : > { %3131 = vmatprep.subr.bf16.mxu1 %v4576_v11  ;;  %v4660_v11 = vld [vmem:[%s5104_s21 + $0x9f4] ss:$8 sps:$4 sm:$0xff]  }
 0x13c   : > { %3089 = vmatpush2.bf16.msra.mxu0 %v4571_v12  ;;  %v4655_v12 = vld [vmem:[%s5104_s21 + $0x8f0] ss:$8 sps:$4 sm:$0xff]  }
 0x13d   : > { %3132 = vmatpush2.bf16.msra.mxu1 %v4574_v13  ;;  %3090 = vmatprep.subr.bf16.mxu0 %v4579_v14  ;;  %v4658_v13 = vld [vmem:[%s5104_s21 + $0x9f0] ss:$8 sps:$4 sm:$0xff]   ;;  %v4663_v14 = vld [vmem:[%s5104_s21 + $0x8e4] ss:$8 sps:$4 sm:$0xff]  }
 0x13e   : > { %3133 = vmatprep.subr.bf16.mxu1 %v4582_v15  ;;  %v4666_v15 = vld [vmem:[%s5104_s21 + $0x9e4] ss:$8 sps:$4 sm:$0xff]  }
 0x140   : > { %3091 = vmatpush2.bf16.msra.mxu0 %v4577_v16  ;;  %v4661_v16 = vld [vmem:[%s5104_s21 + $0x8e0] ss:$8 sps:$4 sm:$0xff]  }
 0x141   : > { %3134 = vmatpush2.bf16.msra.mxu1 %v4580_v17  ;;  %3092 = vmatprep.subr.bf16.mxu0 %v4585_v18  ;;  %v4664_v17 = vld [vmem:[%s5104_s21 + $0x9e0] ss:$8 sps:$4 sm:$0xff]   ;;  %v4669_v18 = vld [vmem:[%s5104_s21 + $0x8d4] ss:$8 sps:$4 sm:$0xff]  }
 0x142   : > { %3135 = vmatprep.subr.bf16.mxu1 %v4588_v19  ;;  %v4672_v19 = vld [vmem:[%s5104_s21 + $0x9d4] ss:$8 sps:$4 sm:$0xff]  }
 0x144   : > { %3093 = vmatpush2.bf16.msra.mxu0 %v4583_v20  ;;  %v4667_v20 = vld [vmem:[%s5104_s21 + $0x8d0] ss:$8 sps:$4 sm:$0xff]  }
 0x145   : > { %3136 = vmatpush2.bf16.msra.mxu1 %v4586_v21  ;;  %3094 = vmatprep.subr.bf16.mxu0 %v4591_v22  ;;  %v4670_v21 = vld [vmem:[%s5104_s21 + $0x9d0] ss:$8 sps:$4 sm:$0xff]   ;;  %v4675_v22 = vld [vmem:[%s5104_s21 + $0x8c4] ss:$8 sps:$4 sm:$0xff]  }
 0x146   : > { %3137 = vmatprep.subr.bf16.mxu1 %v4594_v23  ;;  %v4678_v23 = vld [vmem:[%s5104_s21 + $0x9c4] ss:$8 sps:$4 sm:$0xff]  }
 0x148   : > { %3095 = vmatpush2.bf16.msra.mxu0 %v4589_v24  ;;  %v4673_v24 = vld [vmem:[%s5104_s21 + $0x8c0] ss:$8 sps:$4 sm:$0xff]  }
 0x149   : > { %3138 = vmatpush2.bf16.msra.mxu1 %v4592_v25  ;;  %3096 = vmatprep.subr.bf16.mxu0 %v4597_v26  ;;  %v4676_v25 = vld [vmem:[%s5104_s21 + $0x9c0] ss:$8 sps:$4 sm:$0xff]   ;;  %v4681_v26 = vld [vmem:[%s5104_s21 + $0x8b4] ss:$8 sps:$4 sm:$0xff]  }
 0x14a   : > { %3139 = vmatprep.subr.bf16.mxu1 %v4600_v27  ;;  %v4684_v27 = vld [vmem:[%s5104_s21 + $0x9b4] ss:$8 sps:$4 sm:$0xff]  }
 0x14c   : > { %3097 = vmatpush2.bf16.msra.mxu0 %v4595_v32  ;;  %v4679_v32 = vld [vmem:[%s5104_s21 + $0x8b0] ss:$8 sps:$4 sm:$0xff]  }
 0x14d   : > { %3140 = vmatpush2.bf16.msra.mxu1 %v4598_v33  ;;  %3098 = vmatprep.subr.bf16.mxu0 %v4603_v36  ;;  %v4682_v33 = vld [vmem:[%s5104_s21 + $0x9b0] ss:$8 sps:$4 sm:$0xff]   ;;  %v4687_v36 = vld [vmem:[%s5104_s21 + $0x8a4] ss:$8 sps:$4 sm:$0xff]  }
 0x14e   : > { %3141 = vmatprep.subr.bf16.mxu1 %v4606_v37  ;;  %v4690_v37 = vld [vmem:[%s5104_s21 + $0x9a4] ss:$8 sps:$4 sm:$0xff]  }
 0x150   : > { %3099 = vmatpush2.bf16.msra.mxu0 %v4601_v40  ;;  %v4685_v40 = vld [vmem:[%s5104_s21 + $0x8a0] ss:$8 sps:$4 sm:$0xff]  }
 0x151   : > { %3142 = vmatpush2.bf16.msra.mxu1 %v4604_v28  ;;  %3154 = vmatprep.subr.bf16.mxu0 %v4609_v29  ;;  %v4688_v28 = vld [vmem:[%s5104_s21 + $0x9a0] ss:$8 sps:$4 sm:$0xff]   ;;  %v4693_v29 = vld [vmem:[%s5104_s21 + $0x894] ss:$8 sps:$4 sm:$0xff]  }
 0x152   : > { %3197 = vmatprep.subr.bf16.mxu1 %v4612_v30  ;;  %v4696_v30 = vld [vmem:[%s5104_s21 + $0x994] ss:$8 sps:$4 sm:$0xff]  }
 0x153   : > { %3101 = vmatmul.mubr.bf16.vlgmr.msra.gmra.mxu0 %v3744_v44  ;;  %v4699_v44 = vld [vmem:[%s5104_s21 + $0x884] ss:$8 sps:$4 sm:$0xff]  }
 0x154   : > { %3144 = vmatmul.mubr.bf16.vlgmr.msra.gmra.mxu1 %v3746_v45  ;;  %3155 = vmatpush1.bf16.msra.mxu0 %v4607_v31  ;;  %v4691_v31 = vld [vmem:[%s5104_s21 + $0x890] ss:$8 sps:$4 sm:$0xff]   ;;  %v4702_v45 = vld [vmem:[%s5104_s21 + $0x984] ss:$8 sps:$4 sm:$0xff]  }
 0x155   : > { %3198 = vmatpush1.bf16.msra.mxu1 %v4610_v41  ;;  %3156 = vmatprep.subr.bf16.mxu0 %v4615_v48  ;;  %v4694_v41 = vld [vmem:[%s5104_s21 + $0x990] ss:$8 sps:$4 sm:$0xff]   ;;  %v4697_v48 = vld [vmem:[%s5104_s21 + $0x880] ss:$8 sps:$4 sm:$0xff]  }
 0x156   : > { %3199 = vmatprep.subr.bf16.mxu1 %v4618_v34  ;;  %3186 = vmatprep.mubr.bf16.mxu0 %v3749_v35  ;;  %v4700_v34 = vld [vmem:[%s5104_s21 + $0x980] ss:$8 sps:$4 sm:$0xff]   ;;  %v4705_v35 = vld [vmem:[%s5104_s21 + $0xa74] ss:$8 sps:$4 sm:$0xff]  }
 0x157   : > { %3229 = vmatprep.mubr.bf16.mxu1 %v3751_v38  ;;  %v4708_v38 = vld [vmem:[%s5104_s21 + $0xb74] ss:$8 sps:$4 sm:$0xff]  }
 0x158   : > { %3157 = vmatpush1.bf16.msra.mxu0 %v4613_v39  ;;  %v5563_v39 = vld [vmem:[%s5720_s0 + $0x50] sm:$0xff] }
 0x159   : > { %3200 = vmatpush1.bf16.msra.mxu1 %v4616_v49  ;;  %3158 = vmatprep.subr.bf16.mxu0 %v4621_v50  ;;  %v3748_v49 = vcombine.low %v5473_v42, %v5478_v43  ;;  %v3750_v50 = vcombine.low %v5487_v46, %v5492_v47  ;;  %v4703_v42 = vld [vmem:[%s5104_s21 + $0xa70] ss:$8 sps:$4 sm:$0xff]   ;;  %v4711_v46 = vld [vmem:[%s5104_s21 + $0xa64] ss:$8 sps:$4 sm:$0xff]  }
 0x15a   : > { %3201 = vmatprep.subr.bf16.mxu1 %v4624_v51  ;;  %v5572_v51 = vld [vmem:[%s5720_s0 + $0xb0] sm:$0xff]  ;;  %v4714_v47 = vld [vmem:[%s5104_s21 + $0xb64] ss:$8 sps:$4 sm:$0xff]  }
 0x15b   : > { %v4706_v43 = vld [vmem:[%s5104_s21 + $0xb70] ss:$8 sps:$4 sm:$0xff]  }
 0x15c   : > { %3159 = vmatpush1.bf16.msra.mxu0 %v4619_v52  ;;  %v5577_v52 = vld [vmem:[%s5720_s0 + $0x58] sm:$0xff] }
 0x15d   : > { %3202 = vmatpush1.bf16.msra.mxu1 %v4622_v53  ;;  %3160 = vmatprep.subr.bf16.mxu0 %v4627_v54  ;;  %v5582_v53 = vld [vmem:[%s5720_s0 + $0xb8] sm:$0xff]  ;;  %v3753_v54 = vcombine.high %v5563_v39, %v5572_v51 }
 0x15e   : > { %3203 = vmatprep.subr.bf16.mxu1 %v4630_v55  ;;  %v3755_v55 = vcombine.high %v5577_v52, %v5582_v53 }
 0x160   : > { %3161 = vmatpush1.bf16.msra.mxu0 %v4625_v56  ;;  %v4709_v56 = vld [vmem:[%s5104_s21 + $0xa60] ss:$8 sps:$4 sm:$0xff]  }
 0x161   : > { %3204 = vmatpush1.bf16.msra.mxu1 %v4628_v57  ;;  %3162 = vmatprep.subr.bf16.mxu0 %v4633_v58  ;;  %v4712_v57 = vld [vmem:[%s5104_s21 + $0xb60] ss:$8 sps:$4 sm:$0xff]   ;;  %v4717_v58 = vld [vmem:[%s5104_s21 + $0xa54] ss:$8 sps:$4 sm:$0xff]  }
 0x162   : > { %3205 = vmatprep.subr.bf16.mxu1 %v4636_v59  ;;  %v4720_v59 = vld [vmem:[%s5104_s21 + $0xb54] ss:$8 sps:$4 sm:$0xff]  }
 0x164   : > { %3163 = vmatpush1.bf16.msra.mxu0 %v4631_v60  ;;  %v4715_v60 = vld [vmem:[%s5104_s21 + $0xa50] ss:$8 sps:$4 sm:$0xff]  }
 0x165   : > { %3206 = vmatpush1.bf16.msra.mxu1 %v4634_v61  ;;  %3164 = vmatprep.subr.bf16.mxu0 %v4639_v62  ;;  %v4718_v61 = vld [vmem:[%s5104_s21 + $0xb50] ss:$8 sps:$4 sm:$0xff]   ;;  %v4723_v62 = vld [vmem:[%s5104_s21 + $0xa44] ss:$8 sps:$4 sm:$0xff]  }
 0x166   : > { %3207 = vmatprep.subr.bf16.mxu1 %v4642_v63  ;;  %v4726_v63 = vld [vmem:[%s5104_s21 + $0xb44] ss:$8 sps:$4 sm:$0xff]  }
 0x168   : > { %3165 = vmatpush1.bf16.msra.mxu0 %v4637_v0  ;;  %v3342_v0 = vld [vmem:[%s5723_s3] sm:$0xff] }
 0x169   : > { %3208 = vmatpush1.bf16.msra.mxu1 %v4640_v1  ;;  %3166 = vmatprep.subr.bf16.mxu0 %v4645_v2  ;;  %v3326_v1 = vld [vmem:[%s5722_s2] sm:$0xff]  ;;  %v4944_v2 = vmov 0  }
 0x16a   : > { %3209 = vmatprep.subr.bf16.mxu1 %v4648_v3  ;;  %4222 = vset.pattern.permute.xlu1 %v4944_v2  ;;  %v4721_v3 = vld [vmem:[%s5104_s21 + $0xa40] ss:$8 sps:$4 sm:$0xff]  }
 0x16b   : > { %4221 = vset.pattern.permute.xlu0 %v4944_v2  ;;  %3350 = vperm.xlu1 %4222, %v3342_v0   ;;  %v4802_v0 = vld [vmem:[%s5112_s10 + $0x60] ss:$8 sps:$4 sm:$0xff]   ;;  %v4811_v2 = vld [vmem:[%s5112_s10 + $0x30] ss:$8 sps:$4 sm:$0xff]  }
 0x16c   : > { %3167 = vmatpush1.bf16.msra.mxu0 %v4643_v4  ;;  %3330 = vperm.xlu0 %4221, %v3326_v1   ;;  %v4724_v4 = vld [vmem:[%s5104_s21 + $0xb40] ss:$8 sps:$4 sm:$0xff]   ;;  %v4813_v1 = vld [vmem:[%s5112_s10 + $0x34] ss:$8 sps:$4 sm:$0xff]  }
 0x16d   : > { %3210 = vmatpush1.bf16.msra.mxu1 %v4646_v5  ;;  %3168 = vmatprep.subr.bf16.mxu0 %v4651_v6  ;;  %v3343_v5 = vld [vmem:[%s5723_s3 + $0x8] sm:$0xff] }
 0x16e   : > { %3211 = vmatprep.subr.bf16.mxu1 %v4654_v7  ;;  %v3327_v6 = vld [vmem:[%s5722_s2 + $0x8] sm:$0xff]  ;;  %v4729_v7 = vld [vmem:[%s5104_s21 + $0xa34] ss:$8 sps:$4 sm:$0xff]  }
 0x16f   : > { %3355 = vperm.xlu1 %4222, %v3343_v5   ;;  %v4819_v5 = vld [vmem:[%s5112_s10 + $0x14] ss:$8 sps:$4 sm:$0xff]  }
 0x170   : > { %3169 = vmatpush1.bf16.msra.mxu0 %v4649_v8  ;;  %v4732_v8 = vld [vmem:[%s5104_s21 + $0xb34] ss:$8 sps:$4 sm:$0xff]   ;;  %3335 = vperm.xlu0 %4221, %v3327_v6   ;;  %v4817_v6 = vld [vmem:[%s5112_s10 + $0x10] ss:$8 sps:$4 sm:$0xff]  }
 0x171   : > { %3212 = vmatpush1.bf16.msra.mxu1 %v4652_v9  ;;  %3170 = vmatprep.subr.bf16.mxu0 %v4657_v10  ;;  %v4727_v9 = vld [vmem:[%s5104_s21 + $0xa30] ss:$8 sps:$4 sm:$0xff]  }
 0x172   : > { %3213 = vmatprep.subr.bf16.mxu1 %v4660_v11  ;;  %v4730_v10 = vld [vmem:[%s5104_s21 + $0xb30] ss:$8 sps:$4 sm:$0xff]   ;;  %v4735_v11 = vld [vmem:[%s5104_s21 + $0xa24] ss:$8 sps:$4 sm:$0xff]  }
 0x174   : > { %3171 = vmatpush2.bf16.msra.mxu0 %v4655_v12  ;;  %v4738_v12 = vld [vmem:[%s5104_s21 + $0xb24] ss:$8 sps:$4 sm:$0xff]  }
 0x175   : > { %3214 = vmatpush2.bf16.msra.mxu1 %v4658_v13  ;;  %3172 = vmatprep.subr.bf16.mxu0 %v4663_v14  ;;  %v4733_v13 = vld [vmem:[%s5104_s21 + $0xa20] ss:$8 sps:$4 sm:$0xff]  }
 0x176   : > { %3215 = vmatprep.subr.bf16.mxu1 %v4666_v15  ;;  %v4736_v14 = vld [vmem:[%s5104_s21 + $0xb20] ss:$8 sps:$4 sm:$0xff]   ;;  %v4741_v15 = vld [vmem:[%s5104_s21 + $0xa14] ss:$8 sps:$4 sm:$0xff]  }
 0x178   : > { %3173 = vmatpush2.bf16.msra.mxu0 %v4661_v16  ;;  %v4744_v16 = vld [vmem:[%s5104_s21 + $0xb14] ss:$8 sps:$4 sm:$0xff]  }
 0x179   : > { %3216 = vmatpush2.bf16.msra.mxu1 %v4664_v17  ;;  %3174 = vmatprep.subr.bf16.mxu0 %v4669_v18  ;;  %v4739_v17 = vld [vmem:[%s5104_s21 + $0xa10] ss:$8 sps:$4 sm:$0xff]  }
 0x17a   : > { %3217 = vmatprep.subr.bf16.mxu1 %v4672_v19  ;;  %v4742_v18 = vld [vmem:[%s5104_s21 + $0xb10] ss:$8 sps:$4 sm:$0xff]   ;;  %v4747_v19 = vld [vmem:[%s5104_s21 + $0xa04] ss:$8 sps:$4 sm:$0xff]  }
 0x17c   : > { %3175 = vmatpush2.bf16.msra.mxu0 %v4667_v20  ;;  %v4750_v20 = vld [vmem:[%s5104_s21 + $0xb04] ss:$8 sps:$4 sm:$0xff]  }
 0x17d   : > { %3218 = vmatpush2.bf16.msra.mxu1 %v4670_v21  ;;  %3176 = vmatprep.subr.bf16.mxu0 %v4675_v22  ;;  %v4745_v21 = vld [vmem:[%s5104_s21 + $0xa00] ss:$8 sps:$4 sm:$0xff]  }
 0x17e   : > { %3219 = vmatprep.subr.bf16.mxu1 %v4678_v23  ;;  %v4748_v22 = vld [vmem:[%s5104_s21 + $0xb00] ss:$8 sps:$4 sm:$0xff]   ;;  %v4753_v23 = vld [vmem:[%s5104_s21 + $0xaf4] ss:$8 sps:$4 sm:$0xff]  }
 0x180   : > { %3177 = vmatpush2.bf16.msra.mxu0 %v4673_v24  ;;  %v4756_v24 = vld [vmem:[%s5104_s21 + $0xbf4] ss:$8 sps:$4 sm:$0xff]  }
 0x181   : > { %3220 = vmatpush2.bf16.msra.mxu1 %v4676_v25  ;;  %3178 = vmatprep.subr.bf16.mxu0 %v4681_v26  ;;  %v4751_v25 = vld [vmem:[%s5104_s21 + $0xaf0] ss:$8 sps:$4 sm:$0xff]  }
 0x182   : > { %3221 = vmatprep.subr.bf16.mxu1 %v4684_v27  ;;  %v4754_v26 = vld [vmem:[%s5104_s21 + $0xbf0] ss:$8 sps:$4 sm:$0xff]   ;;  %v4759_v27 = vld [vmem:[%s5104_s21 + $0xae4] ss:$8 sps:$4 sm:$0xff]  }
 0x184   : > { %3179 = vmatpush2.bf16.msra.mxu0 %v4679_v32  ;;  %v4762_v32 = vld [vmem:[%s5104_s21 + $0xbe4] ss:$8 sps:$4 sm:$0xff]  }
 0x185   : > { %3222 = vmatpush2.bf16.msra.mxu1 %v4682_v33  ;;  %3180 = vmatprep.subr.bf16.mxu0 %v4687_v36  ;;  %v4757_v33 = vld [vmem:[%s5104_s21 + $0xae0] ss:$8 sps:$4 sm:$0xff]  }
 0x186   : > { %3223 = vmatprep.subr.bf16.mxu1 %v4690_v37  ;;  %v4760_v36 = vld [vmem:[%s5104_s21 + $0xbe0] ss:$8 sps:$4 sm:$0xff]   ;;  %v4765_v37 = vld [vmem:[%s5104_s21 + $0xad4] ss:$8 sps:$4 sm:$0xff]  }
 0x188   : > { %3181 = vmatpush2.bf16.msra.mxu0 %v4685_v40  ;;  %v4768_v40 = vld [vmem:[%s5104_s21 + $0xbd4] ss:$8 sps:$4 sm:$0xff]  }
 0x189   : > { %3224 = vmatpush2.bf16.msra.mxu1 %v4688_v28  ;;  %3182 = vmatprep.subr.bf16.mxu0 %v4693_v29  ;;  %v4763_v28 = vld [vmem:[%s5104_s21 + $0xad0] ss:$8 sps:$4 sm:$0xff]  }
 0x18a   : > { %3225 = vmatprep.subr.bf16.mxu1 %v4696_v30  ;;  %v4766_v29 = vld [vmem:[%s5104_s21 + $0xbd0] ss:$8 sps:$4 sm:$0xff]   ;;  %v4771_v30 = vld [vmem:[%s5104_s21 + $0xac4] ss:$8 sps:$4 sm:$0xff]  }
 0x18c   : > { %3183 = vmatpush2.bf16.msra.mxu0 %v4691_v31  ;;  %v4774_v31 = vld [vmem:[%s5104_s21 + $0xbc4] ss:$8 sps:$4 sm:$0xff]  }
 0x18d   : > { %3226 = vmatpush2.bf16.msra.mxu1 %v4694_v41  ;;  %3184 = vmatprep.subr.bf16.mxu0 %v4699_v44  ;;  %v4769_v41 = vld [vmem:[%s5104_s21 + $0xac0] ss:$8 sps:$4 sm:$0xff]  }
 0x18e   : > { %3227 = vmatprep.subr.bf16.mxu1 %v4702_v45  ;;  %v4772_v44 = vld [vmem:[%s5104_s21 + $0xbc0] ss:$8 sps:$4 sm:$0xff]   ;;  %v4777_v45 = vld [vmem:[%s5104_s21 + $0xab4] ss:$8 sps:$4 sm:$0xff]  }
 0x190   : > { %3185 = vmatpush2.bf16.msra.mxu0 %v4697_v48  ;;  %v4780_v48 = vld [vmem:[%s5104_s21 + $0xbb4] ss:$8 sps:$4 sm:$0xff]  }
 0x191   : > { %3228 = vmatpush2.bf16.msra.mxu1 %v4700_v34  ;;  %3240 = vmatprep.subr.bf16.mxu0 %v4705_v35  ;;  %v4775_v34 = vld [vmem:[%s5104_s21 + $0xab0] ss:$8 sps:$4 sm:$0xff]  }
 0x192   : > { %3283 = vmatprep.subr.bf16.mxu1 %v4708_v38  ;;  %v4778_v35 = vld [vmem:[%s5104_s21 + $0xbb0] ss:$8 sps:$4 sm:$0xff]   ;;  %v4783_v38 = vld [vmem:[%s5104_s21 + $0xaa4] ss:$8 sps:$4 sm:$0xff]  }
 0x193   : > { %3187 = vmatmul.mubr.bf16.vlgmr.msra.gmra.mxu0 %v3748_v49  ;;  %v4786_v49 = vld [vmem:[%s5104_s21 + $0xba4] ss:$8 sps:$4 sm:$0xff]  }
 0x194   : > { %3230 = vmatmul.mubr.bf16.vlgmr.msra.gmra.mxu1 %v3750_v50  ;;  %3241 = vmatpush1.bf16.msra.mxu0 %v4703_v42  ;;  %v4781_v50 = vld [vmem:[%s5104_s21 + $0xaa0] ss:$8 sps:$4 sm:$0xff]  }
 0x195   : > { %3284 = vmatpush1.bf16.msra.mxu1 %v4706_v43  ;;  %3242 = vmatprep.subr.bf16.mxu0 %v4711_v46  ;;  %v4784_v42 = vld [vmem:[%s5104_s21 + $0xba0] ss:$8 sps:$4 sm:$0xff]   ;;  %v4789_v43 = vld [vmem:[%s5104_s21 + $0xa94] ss:$8 sps:$4 sm:$0xff]  }
 0x196   : > { %3285 = vmatprep.subr.bf16.mxu1 %v4714_v47  ;;  %3272 = vmatprep.mubr.bf16.mxu0 %v3753_v54  ;;  %v4792_v46 = vld [vmem:[%s5104_s21 + $0xb94] ss:$8 sps:$4 sm:$0xff]   ;;  %v4787_v47 = vld [vmem:[%s5104_s21 + $0xa90] ss:$8 sps:$4 sm:$0xff]  }
 0x197   : > { %3315 = vmatprep.mubr.bf16.mxu1 %v3755_v55  ;;  %v4790_v54 = vld [vmem:[%s5104_s21 + $0xb90] ss:$8 sps:$4 sm:$0xff]   ;;  %v4795_v55 = vld [vmem:[%s5104_s21 + $0xa84] ss:$8 sps:$4 sm:$0xff]  }
 0x198   : > { %3243 = vmatpush1.bf16.msra.mxu0 %v4709_v56  ;;  %v4798_v56 = vld [vmem:[%s5104_s21 + $0xb84] ss:$8 sps:$4 sm:$0xff]  }
 0x199   : > { %3286 = vmatpush1.bf16.msra.mxu1 %v4712_v57  ;;  %3244 = vmatprep.subr.bf16.mxu0 %v4717_v58  ;;  %v4793_v57 = vld [vmem:[%s5104_s21 + $0xa80] ss:$8 sps:$4 sm:$0xff]  }
 0x19a   : > { %3287 = vmatprep.subr.bf16.mxu1 %v4720_v59  ;;  %v4796_v58 = vld [vmem:[%s5104_s21 + $0xb80] ss:$8 sps:$4 sm:$0xff]   ;;  %v3752_v59 = vcombine.low %v5563_v39, %v5572_v51  ;;  %v4807_v39 = vld [vmem:[%s5112_s10 + $0x54] ss:$8 sps:$4 sm:$0xff]   ;;  %v4805_v51 = vld [vmem:[%s5112_s10 + $0x50] ss:$8 sps:$4 sm:$0xff]  }
 0x19b   : > { %s4178_s21 = sshll.u32 %s5734_s25, 5 }
 0x19c   : > { %3245 = vmatpush1.bf16.msra.mxu0 %v4715_v60  ;;  %v3754_v60 = vcombine.low %v5577_v52, %v5582_v53  ;;  %v4810_v52 = vld [vmem:[%s5112_s10 + $0x44] ss:$8 sps:$4 sm:$0xff]   ;;  %v4808_v53 = vld [vmem:[%s5112_s10 + $0x40] ss:$8 sps:$4 sm:$0xff]   ;;  %s361_s16 = scalar_lea.vmem %s5726_s6, %s4178_s21 }
 0x19d   : > { %3288 = vmatpush1.bf16.msra.mxu1 %v4718_v61  ;;  %3246 = vmatprep.subr.bf16.mxu0 %v4723_v62  ;;  %v4799_v61 = vld [vmem:[%s5112_s10 + $0x70] ss:$8 sps:$4 sm:$0xff]   ;;  %v4801_v62 = vld [vmem:[%s5112_s10 + $0x74] ss:$8 sps:$4 sm:$0xff]  }
 0x19e   : > { %3289 = vmatprep.subr.bf16.mxu1 %v4726_v63  ;;  %v4804_v63 = vld [vmem:[%s5112_s10 + $0x64] ss:$8 sps:$4 sm:$0xff]  }
 0x1a0   : > { %3247 = vmatpush1.bf16.msra.mxu0 %v4721_v3  ;;  %v4816_v3 = vld [vmem:[%s5112_s10 + $0x24] ss:$8 sps:$4 sm:$0xff]  }
 0x1a1   : > { %3290 = vmatpush1.bf16.msra.mxu1 %v4724_v4  ;;  %3248 = vmatprep.subr.bf16.mxu0 %v4729_v7  ;;  %v4814_v4 = vld [vmem:[%s5112_s10 + $0x20] ss:$8 sps:$4 sm:$0xff]   ;;  %v4822_v7 = vld [vmem:[%s5112_s10 + $0x4] ss:$8 sps:$4 sm:$0xff]  }
 0x1a2   : > { %3291 = vmatprep.subr.bf16.mxu1 %v4732_v8  ;;  %v4820_v8 = vld [vmem:[%s5112_s10] ss:$8 sps:$4 sm:$0xff]  }
 0x1a4   : > { %3249 = vmatpush1.bf16.msra.mxu0 %v4727_v9  ;;  %v4825_v9 = vld [vmem:[%s5112_s10 + $0xf4] ss:$8 sps:$4 sm:$0xff]  }
 0x1a5   : > { %3292 = vmatpush1.bf16.msra.mxu1 %v4730_v10  ;;  %3250 = vmatprep.subr.bf16.mxu0 %v4735_v11  ;;  %v4823_v10 = vld [vmem:[%s5112_s10 + $0xf0] ss:$8 sps:$4 sm:$0xff]   ;;  %v4828_v11 = vld [vmem:[%s5112_s10 + $0xe4] ss:$8 sps:$4 sm:$0xff]  }
 0x1a6   : > { %3293 = vmatprep.subr.bf16.mxu1 %v4738_v12  ;;  %v4826_v12 = vld [vmem:[%s5112_s10 + $0xe0] ss:$8 sps:$4 sm:$0xff]  }
 0x1a8   : > { %3251 = vmatpush1.bf16.msra.mxu0 %v4733_v13  ;;  %v4831_v13 = vld [vmem:[%s5112_s10 + $0xd4] ss:$8 sps:$4 sm:$0xff]  }
 0x1a9   : > { %3294 = vmatpush1.bf16.msra.mxu1 %v4736_v14  ;;  %3252 = vmatprep.subr.bf16.mxu0 %v4741_v15  ;;  %v4829_v14 = vld [vmem:[%s5112_s10 + $0xd0] ss:$8 sps:$4 sm:$0xff]   ;;  %v4834_v15 = vld [vmem:[%s5112_s10 + $0xc4] ss:$8 sps:$4 sm:$0xff]  }
 0x1aa   : > { %3295 = vmatprep.subr.bf16.mxu1 %v4744_v16  ;;  %v4832_v16 = vld [vmem:[%s5112_s10 + $0xc0] ss:$8 sps:$4 sm:$0xff]  }
 0x1ac   : > { %3253 = vmatpush1.bf16.msra.mxu0 %v4739_v17  ;;  %v4837_v17 = vld [vmem:[%s5112_s10 + $0xb4] ss:$8 sps:$4 sm:$0xff]  }
 0x1ad   : > { %3296 = vmatpush1.bf16.msra.mxu1 %v4742_v18  ;;  %3254 = vmatprep.subr.bf16.mxu0 %v4747_v19  ;;  %v4835_v18 = vld [vmem:[%s5112_s10 + $0xb0] ss:$8 sps:$4 sm:$0xff]   ;;  %v4840_v19 = vld [vmem:[%s5112_s10 + $0xa4] ss:$8 sps:$4 sm:$0xff]  }
 0x1ae   : > { %3297 = vmatprep.subr.bf16.mxu1 %v4750_v20  ;;  %v4838_v20 = vld [vmem:[%s5112_s10 + $0xa0] ss:$8 sps:$4 sm:$0xff]  }
 0x1b0   : > { %3255 = vmatpush1.bf16.msra.mxu0 %v4745_v21  ;;  %v4843_v21 = vld [vmem:[%s5112_s10 + $0x94] ss:$8 sps:$4 sm:$0xff]  }
 0x1b1   : > { %3298 = vmatpush1.bf16.msra.mxu1 %v4748_v22  ;;  %3256 = vmatprep.subr.bf16.mxu0 %v4753_v23  ;;  %v4841_v22 = vld [vmem:[%s5112_s10 + $0x90] ss:$8 sps:$4 sm:$0xff]   ;;  %v4846_v23 = vld [vmem:[%s5112_s10 + $0x84] ss:$8 sps:$4 sm:$0xff]  }
 0x1b2   : > { %3299 = vmatprep.subr.bf16.mxu1 %v4756_v24  ;;  %v4844_v24 = vld [vmem:[%s5112_s10 + $0x80] ss:$8 sps:$4 sm:$0xff]  }
 0x1b4   : > { %3257 = vmatpush2.bf16.msra.mxu0 %v4751_v25  ;;  %v2844_v25 = vpop.f32.mrf.mxu0 }
 0x1b5   : > { %3300 = vmatpush2.bf16.msra.mxu1 %v4754_v26  ;;  %3258 = vmatprep.subr.bf16.mxu0 %v4759_v27  ;;  %v2887_v26 = vpop.f32.mrf.mxu1 }
 0x1b6   : > { %3301 = vmatprep.subr.bf16.mxu1 %v4762_v32  ;;  %v2846_v27 = vpop.f32.mrf.mxu0 }
 0x1b7   : > { %v2889_v32 = vpop.f32.mrf.mxu1 }
 0x1b8   : > { %3259 = vmatpush2.bf16.msra.mxu0 %v4757_v33  ;;  %v2848_v33 = vpop.f32.mrf.mxu0 }
 0x1b9   : > { %3302 = vmatpush2.bf16.msra.mxu1 %v4760_v36  ;;  %3260 = vmatprep.subr.bf16.mxu0 %v4765_v37  ;;  %v2891_v36 = vpop.f32.mrf.mxu1 }
 0x1ba   : > { %3303 = vmatprep.subr.bf16.mxu1 %v4768_v40  ;;  %v2850_v37 = vpop.f32.mrf.mxu0 }
 0x1bb   : > { %v2893_v40 = vpop.f32.mrf.mxu1 }
 0x1bc   : > { %3261 = vmatpush2.bf16.msra.mxu0 %v4763_v28  ;;  %v2930_v28 = vpop.f32.mrf.mxu0 }
 0x1bd   : > { %3304 = vmatpush2.bf16.msra.mxu1 %v4766_v29  ;;  %3262 = vmatprep.subr.bf16.mxu0 %v4771_v30  ;;  %v2973_v29 = vpop.f32.mrf.mxu1 }
 0x1be   : > { %3305 = vmatprep.subr.bf16.mxu1 %v4774_v31  ;;  %v2932_v30 = vpop.f32.mrf.mxu0 }
 0x1bf   : > { %v2975_v31 = vpop.f32.mrf.mxu1 }
 0x1c0   : > { %3263 = vmatpush2.bf16.msra.mxu0 %v4769_v41  ;;  %v2934_v41 = vpop.f32.mrf.mxu0 }
 0x1c1   : > { %3306 = vmatpush2.bf16.msra.mxu1 %v4772_v44  ;;  %3264 = vmatprep.subr.bf16.mxu0 %v4777_v45  ;;  %v2977_v44 = vpop.f32.mrf.mxu1 }
 0x1c2   : > { %3307 = vmatprep.subr.bf16.mxu1 %v4780_v48  ;;  %v2936_v45 = vpop.f32.mrf.mxu0 }
 0x1c3   : > { %v2979_v48 = vpop.f32.mrf.mxu1 }
 0x1c4   : > { %3265 = vmatpush2.bf16.msra.mxu0 %v4775_v34 }
 0x1c5   : > { %3308 = vmatpush2.bf16.msra.mxu1 %v4778_v35  ;;  %3266 = vmatprep.subr.bf16.mxu0 %v4783_v38 }
 0x1c6   : > { %3309 = vmatprep.subr.bf16.mxu1 %v4786_v49 }
 0x1c8   : > { %3267 = vmatpush2.bf16.msra.mxu0 %v4781_v50 }
 0x1c9   : > { %3310 = vmatpush2.bf16.msra.mxu1 %v4784_v42  ;;  %3268 = vmatprep.subr.bf16.mxu0 %v4789_v43 }
 0x1ca   : > { %3311 = vmatprep.subr.bf16.mxu1 %v4792_v46 }
 0x1cc   : > { %3269 = vmatpush2.bf16.msra.mxu0 %v4787_v47 }
 0x1cd   : > { %3312 = vmatpush2.bf16.msra.mxu1 %v4790_v54  ;;  %3270 = vmatprep.subr.bf16.mxu0 %v4795_v55  ;;  %v2888_v55 = vadd.f32 %v2887_v26, %v2844_v25 }
 0x1ce   : > { %3313 = vmatprep.subr.bf16.mxu1 %v4798_v56 }
 0x1d0   : > { %3271 = vmatpush2.bf16.msra.mxu0 %v4793_v57 }
 0x1d1   : > { %3314 = vmatpush2.bf16.msra.mxu1 %v4796_v58  ;;  %3560 = vmatprep.subr.bf16.mxu0 %v4801_v62  ;;  %v2890_v58 = vadd.f32 %v2889_v32, %v2846_v27 }
 0x1d3   : > { %3273 = vmatmul.mubr.bf16.vlgmr.msra.gmra.mxu0 %v3752_v59  ;;  %v3016_v34 = vpop.f32.mrf.mxu0  ;;  %v2931_v59 = vadd.f32 %v2930_v28, %v2888_v55 }
 0x1d4   : > { %3316 = vmatmul.mubr.bf16.vlgmr.msra.gmra.mxu1 %v3754_v60  ;;  %3561 = vmatpush1.bf16.msra.mxu0 %v4799_v61  ;;  %v3059_v35 = vpop.f32.mrf.mxu1  ;;  %v2892_v60 = vadd.f32 %v2891_v36, %v2848_v33  ;;  %v2933_v61 = vadd.f32 %v2932_v30, %v2890_v58  ;;  %v3346_v58 = vld [vmem:[%s5110_s17 + $0x10] sm:$0xff] }
 0x1d5   : > { %3562 = vmatprep.subr.bf16.mxu0 %v4804_v63  ;;  %v3018_v38 = vpop.f32.mrf.mxu0 }
 0x1d6   : > { %v3061_v49 = vpop.f32.mrf.mxu1 }
 0x1d7   : > { %v3020_v50 = vpop.f32.mrf.mxu0 }
 0x1d8   : > { %3563 = vmatpush1.bf16.msra.mxu0 %v4802_v0  ;;  %v3063_v42 = vpop.f32.mrf.mxu1  ;;  %v2894_v0 = vadd.f32 %v2893_v40, %v2850_v37 }
 0x1d9   : > { %3564 = vmatprep.subr.bf16.mxu0 %v4807_v39  ;;  %v3022_v43 = vpop.f32.mrf.mxu0  ;;  %v2935_v39 = vadd.f32 %v2934_v41, %v2892_v60 }
 0x1da   : > { %v3065_v46 = vpop.f32.mrf.mxu1 }
 0x1dc   : > { %3565 = vmatpush1.bf16.msra.mxu0 %v4805_v51  ;;  %v2974_v51 = vadd.f32 %v2973_v29, %v2931_v59 }
 0x1dd   : > { %3566 = vmatprep.subr.bf16.mxu0 %v4810_v52  ;;  %v2976_v52 = vadd.f32 %v2975_v31, %v2933_v61  ;;  %v3347_v61 = vld [vmem:[%s5110_s17 + $0x18] sm:$0xff] }
 0x1e0   : > { %3567 = vmatpush1.bf16.msra.mxu0 %v4808_v53  ;;  %v2937_v53 = vadd.f32 %v2936_v45, %v2894_v0 }
 0x1e1   : > { %3568 = vmatprep.subr.bf16.mxu0 %v4813_v1  ;;  %v3017_v1 = vadd.f32 %v3016_v34, %v2974_v51 }
 0x1e4   : > { %3569 = vmatpush1.bf16.msra.mxu0 %v4811_v2 }
 0x1e5   : > { %3570 = vmatprep.subr.bf16.mxu0 %v4816_v3 }
 0x1e6   : > { %v3351_v41 = vpop.permute.xlu1 %3350 }
 0x1e8   : > { %3571 = vmatpush1.bf16.msra.mxu0 %v4814_v4  ;;  %v2978_v4 = vadd.f32 %v2977_v44, %v2935_v39  ;;  %v3331_v44 = vpop.permute.xlu0 %3330 }
 0x1e9   : > { %3572 = vmatprep.subr.bf16.mxu0 %v4819_v5  ;;  %v3019_v5 = vadd.f32 %v3018_v38, %v2976_v52 }
 0x1ea   : > { %v3356_v59 = vpop.permute.xlu1 %3355 }
 0x1ec   : > { %3573 = vmatpush1.bf16.msra.mxu0 %v4817_v6 }
 0x1ed   : > { %3574 = vmatprep.subr.bf16.mxu0 %v4822_v7 }
 0x1f0   : > { %3575 = vmatpush1.bf16.msra.mxu0 %v4820_v8  ;;  %v2980_v8 = vadd.f32 %v2979_v48, %v2937_v53 }
 0x1f1   : > { %3576 = vmatprep.subr.bf16.mxu0 %v4825_v9  ;;  %v3021_v9 = vadd.f32 %v3020_v50, %v2978_v4 }
 0x1f4   : > { %3577 = vmatpush2.bf16.msra.mxu0 %v4823_v10  ;;  %v3060_v10 = vadd.f32 %v3059_v35, %v3017_v1 }
 0x1f5   : > { %3578 = vmatprep.subr.bf16.mxu0 %v4828_v11  ;;  %v3062_v11 = vadd.f32 %v3061_v49, %v3019_v5 }
 0x1f8   : > { %3579 = vmatpush2.bf16.msra.mxu0 %v4826_v12  ;;  %v3023_v12 = vadd.f32 %v3022_v43, %v2980_v8 }
 0x1f9   : > { %3580 = vmatprep.subr.bf16.mxu0 %v4831_v13 }
 0x1fc   : > { %3581 = vmatpush2.bf16.msra.mxu0 %v4829_v14 }
 0x1fd   : > { %3582 = vmatprep.subr.bf16.mxu0 %v4834_v15 }
 0x200   : > { %3583 = vmatpush2.bf16.msra.mxu0 %v4832_v16  ;;  %v3064_v16 = vadd.f32 %v3063_v42, %v3021_v9 }
 0x201   : > { %3584 = vmatprep.subr.bf16.mxu0 %v4837_v17 }
 0x204   : > { %3585 = vmatpush2.bf16.msra.mxu0 %v4835_v18  ;;  %v3066_v18 = vadd.f32 %v3065_v46, %v3023_v12 }
 0x205   : > { %3586 = vmatprep.subr.bf16.mxu0 %v4840_v19 }
 0x208   : > { %3587 = vmatpush2.bf16.msra.mxu0 %v4838_v20 }
 0x209   : > { %3588 = vmatprep.subr.bf16.mxu0 %v4843_v21 }
 0x20c   : > { %3589 = vmatpush2.bf16.msra.mxu0 %v4841_v22 }
 0x20d   : > { %3590 = vmatprep.subr.bf16.mxu0 %v4846_v23 }
 0x210   : > { %3591 = vmatpush2.bf16.msra.mxu0 %v4844_v24 }
 0x213   : > { %v3102_v47 = vpop.f32.mrf.mxu0 }
 0x214   : > { %v3145_v54 = vpop.f32.mrf.mxu1  ;;  %v3103_v13 = vadd.f32 %v3102_v47, %v3060_v10 }
 0x215   : > { %v3104_v56 = vpop.f32.mrf.mxu0 }
 0x216   : > { %v3147_v57 = vpop.f32.mrf.mxu1  ;;  %v3105_v17 = vadd.f32 %v3104_v56, %v3062_v11  ;;  %v3146_v20 = vadd.f32 %v3145_v54, %v3103_v13  ;;  %v3345_v54 = vld [vmem:[%s5110_s17 + $0x8] sm:$0xff]  ;;  %v3344_v56 = vld [vmem:[%s5110_s17] sm:$0xff] }
 0x217   : > { %v3106_v62 = vpop.f32.mrf.mxu0  ;;  %v3359_v0 = vmul.f32 %v3351_v41, %v3345_v54  ;;  %v3358_v53 = vmul.f32 %v3351_v41, %v3344_v56 }
 0x218   : > { %v3149_v63 = vpop.f32.mrf.mxu1  ;;  %v3107_v19 = vadd.f32 %v3106_v62, %v3064_v16  ;;  %v3148_v23 = vadd.f32 %v3147_v57, %v3105_v17  ;;  %v3336_v62 = vpop.permute.xlu0 %3335 }
 0x219   : > { %v3108_v2 = vpop.f32.mrf.mxu0 }
 0x21a   : > { %v3151_v3 = vpop.f32.mrf.mxu1  ;;  %v3109_v24 = vadd.f32 %v3108_v2, %v3066_v18  ;;  %v3150_v26 = vadd.f32 %v3149_v63, %v3107_v19  ;;  %v3360_v2 = vmul.f32 %v3356_v59, %v3346_v58 }
 0x21c   : > { %v3152_v36 = vadd.f32 %v3151_v3, %v3109_v24  ;;  %v3361_v3 = vmul.f32 %v3356_v59, %v3347_v61 }
 0x253   : > { %v3188_v6 = vpop.f32.mrf.mxu0 }
 0x254   : > { %v3231_v7 = vpop.f32.mrf.mxu1  ;;  %v3189_v25 = vadd.f32 %v3188_v6, %v3146_v20 }
 0x255   : > { %v3190_v14 = vpop.f32.mrf.mxu0 }
 0x256   : > { %v3233_v15 = vpop.f32.mrf.mxu1  ;;  %v3191_v27 = vadd.f32 %v3190_v14, %v3148_v23  ;;  %v3232_v40 = vadd.f32 %v3231_v7, %v3189_v25 }
 0x257   : > { %v3192_v21 = vpop.f32.mrf.mxu0 }
 0x258   : > { %v3235_v22 = vpop.f32.mrf.mxu1  ;;  %v3193_v37 = vadd.f32 %v3192_v21, %v3150_v26  ;;  %v3234_v30 = vadd.f32 %v3233_v15, %v3191_v27 }
 0x259   : > { %v3194_v32 = vpop.f32.mrf.mxu0 }
 0x25a   : > { %v3237_v33 = vpop.f32.mrf.mxu1  ;;  %v3195_v31 = vadd.f32 %v3194_v32, %v3152_v36  ;;  %v3236_v35 = vadd.f32 %v3235_v22, %v3193_v37 }
 0x25c   : > { %v3238_v42 = vadd.f32 %v3237_v33, %v3195_v31 }
 0x293   : > { %v3274_v28 = vpop.f32.mrf.mxu0 }
 0x294   : > { %v3317_v29 = vpop.f32.mrf.mxu1  ;;  %v3275_v45 = vadd.f32 %v3274_v28, %v3232_v40 }
 0x295   : > { %v3276_v48 = vpop.f32.mrf.mxu0 }
 0x296   : > { %v3319_v34 = vpop.f32.mrf.mxu1  ;;  %v3277_v38 = vadd.f32 %v3276_v48, %v3234_v30  ;;  %v3318_v47 = vadd.f32 %v3317_v29, %v3275_v45 }
 0x297   : > { %v3278_v49 = vpop.f32.mrf.mxu0 }
 0x298   : > { %v3321_v50 = vpop.f32.mrf.mxu1  ;;  %v3320_v43 = vadd.f32 %v3319_v34, %v3277_v38  ;;  %v3279_v46 = vadd.f32 %v3278_v49, %v3236_v35  ;;  %v3338_v1 = vmul.f32 %v3331_v44, %v3318_v47 }
 0x299   : > { %v3280_v55 = vpop.f32.mrf.mxu0 }
 0x29a   : > { %v3322_v57 = vadd.f32 %v3321_v50, %v3279_v46  ;;  %v3281_v60 = vadd.f32 %v3280_v55, %v3238_v42  ;;  %v3323_v63 = vpop.f32.mrf.mxu1  ;;  %v3339_v39 = vmul.f32 %v3331_v44, %v3320_v43  ;;  %v3362_v8 = vadd.f32 %v3358_v53, %v3338_v1 }
 0x29c   : > { %v3340_v51 = vmul.f32 %v3336_v62, %v3322_v57  ;;  %v3324_v52 = vadd.f32 %v3323_v63, %v3281_v60  ;;  %v3363_v6 = vadd.f32 %v3359_v0, %v3339_v39 }
 0x29e   : > { %v3341_v4 = vmul.f32 %v3336_v62, %v3324_v52  ;;  %v3364_v5 = vadd.f32 %v3360_v2, %v3340_v51 }
 0x2a0   : > { %v3365_v7 = vadd.f32 %v3361_v3, %v3341_v4  ;;  %v3366_v10 = vpack.c.bf16 %v3364_v5, %v3362_v8 }
 0x2a2   : > { %v3367_v9 = vpack.c.bf16 %v3365_v7, %v3363_v6 }
 0x2a4   : > { %3592 = vmatprep.mubr.bf16.mxu0 %v3367_v9 }
 0x2a5   : > { %3593 = vmatmul.mubr.bf16.vlgmr.msra.gmra.mxu0 %v3366_v10 }
 0x365   : > { %v3594_v11 = vpop.f32.mrf.mxu0 }
 0x366   : > { %3603 = vst [vmem:[%s361_s16] sm:$0xff] %v3594_v11 }
 0x367   : > { %v3596_v12 = vpop.f32.mrf.mxu0 }
 0x368   : > { %3604 = vst [vmem:[%s361_s16 + $0x8] sm:$0xff] %v3596_v12 }
 0x369   : > { %v3598_v13 = vpop.f32.mrf.mxu0 }
 0x36a   : > { %3605 = vst [vmem:[%s361_s16 + $0x10] sm:$0xff] %v3598_v13 }
 0x36b   : > { %v3600_v14 = vpop.f32.mrf.mxu0 }
 0x36c   : > { %3606 = vst [vmem:[%s361_s16 + $0x18] sm:$0xff] %v3600_v14 }
 0x36d PF: > { %p19_p6 = scmp.ge.s32.totalorder %s5002_s26, 4   ;;  %s5729_s21 = smov %s4929_s22 }
 0x36e   : > { %s5730_s22 = smov %s4933_s23  ;;  %s5731_s23 = smov %s5012_s29 }
 0x36f   : > { %s5732_s24 = smov %s5002_s26  ;;  %21 = sbr.rel (!%p19_p6) target bundleno = 5 (0x5), region = 128 }
 0x374   :  { %3628 = vsyncpa [#allocation3], 1 }
 0x375   :  { %3630 = vsyncpa [#allocation3 + $0x1], 1 }
 0x376   :  { %3631 = vsyncpa [#allocation6], 1 }
 0x377   :  { %3633 = vsyncpa [#allocation6 + $0x1], 1 }

</bundles_post_ra>
